<compile_context>
chip_gen: v7x
topology: tpu7x:2x2x1
jax: 0.10.0
libtpu: 0.0.40
codegen_flags: <defaults>
</compile_context>

<pallas_src>
import functools

import jax
import jax.numpy as jnp
from jax.experimental import pallas as pl
from jax.experimental.pallas import tpu as pltpu

LANE = 128
_MIB = 1024 * 1024


def _round_up(x, m):
    return (x + m - 1) // m * m


def _compiler_params(est_block_bytes, semantics):
    # explicit scoped-VMEM limit: blocks are double-buffered, leave headroom,
    # stay under v7x's 64 MiB physical VMEM per TensorCore.
    limit = int(min(64 * _MIB, max(16 * _MIB, 3 * est_block_bytes)))
    return pltpu.CompilerParams(dimension_semantics=semantics,
                                vmem_limit_bytes=limit)


# --------------------------------------------------------------------------
# Kernel 1: fused 3x3 stride-1 conv + bias + LeakyReLU (+ residual).
#
# The padded input image is passed flattened as [Hp*Wp (+KW-1), Cin]; the
# shift for tap (i, j) is a contiguous row-slice at offset i*Wp + j.  The
# kernel computes H rows of width Wp (the last KW-1 columns of each row are
# junk from the wrap-around and are sliced off in the wrapper).
# --------------------------------------------------------------------------
def _conv3x3_kernel(*refs, kh, kw, wp, m, use_res):
    if use_res:
        x_ref, w_ref, b_ref, r_ref, o_ref = refs
    else:
        x_ref, w_ref, b_ref, o_ref = refs
        r_ref = None

    acc = jnp.zeros((m, o_ref.shape[-1]), jnp.float32)
    for i in range(kh):
        for j in range(kw):
            d = i * wp + j                                   # static shift
            patch = x_ref[pl.ds(d, m), :]                    # [m, Cin] bf16
            acc += jnp.dot(patch, w_ref[i * kw + j],         # [Cin, Cp] bf16
                           preferred_element_type=jnp.float32)
    y = acc + b_ref[...]                                     # folded-BN bias
    y = jnp.where(y > 0, y, 0.1 * y)                         # LeakyReLU(0.1), f32
    if use_res:
        y = y + r_ref[...].astype(jnp.float32)
    o_ref[...] = y.astype(o_ref.dtype)


def _conv3x3_s1_fused(x, w, bias, cout, residual=None):
    """x: [N,H,W,Cin] bf16; w: [KH,KW,Cin,Cp] bf16 (BN-scale folded, Cout padded);
    bias: [1,Cp] f32; residual: [N,H,W,cout] or None. Returns [N,H,W,cout] bf16."""
    N, H, W, Cin = x.shape
    KH, KW, _, Cp = w.shape
    pad = (KH - 1) // 2
    Hp, Wp = H + 2 * pad, W + 2 * pad
    M = H * Wp                                  # rows computed per image

    xp = jnp.pad(x, ((0, 0), (pad, pad), (pad, pad), (0, 0)))
    # flatten spatially; add KW-1 slack rows so the last shifted slice is in-bounds
    Lf = Hp * Wp + (KW - 1)
    xf = jnp.pad(xp.reshape(N, Hp * Wp, Cin), ((0, 0), (0, KW - 1), (0, 0)))
    w3 = w.reshape(KH * KW, Cin, Cp)

    in_specs = [
        pl.BlockSpec((None, Lf, Cin), lambda n: (n, 0, 0)),       # padded image
        pl.BlockSpec((KH * KW, Cin, Cp), lambda n: (0, 0, 0)),    # weights (resident)
        pl.BlockSpec((1, Cp), lambda n: (0, 0)),                  # bias
    ]
    args = [xf, w3, bias]
    if residual is not None:
        r = jnp.pad(residual.astype(jnp.bfloat16),
                    ((0, 0), (0, 0), (0, Wp - W), (0, Cp - residual.shape[-1])))
        args.append(r.reshape(N, M, Cp))
        in_specs.append(pl.BlockSpec((None, M, Cp), lambda n: (n, 0, 0)))
    out_spec = pl.BlockSpec((None, M, Cp), lambda n: (n, 0, 0))

    est = 2 * (Lf * Cin * 2 + M * Cp * 2) + KH * KW * Cin * Cp * 2 + M * Cp * 4
    kernel = functools.partial(_conv3x3_kernel, kh=KH, kw=KW, wp=Wp, m=M,
                               use_res=residual is not None)
    out = pl.pallas_call(
        kernel,
        out_shape=jax.ShapeDtypeStruct((N, M, Cp), jnp.bfloat16),
        grid_spec=pltpu.PrefetchScalarGridSpec(
            num_scalar_prefetch=0,
            grid=(N,),
            in_specs=in_specs,
            out_specs=out_spec,
        ),
        compiler_params=_compiler_params(est, ("parallel",)),
    )(*args)
    # drop the wrap-around columns and the padded output channels
    return out.reshape(N, H, Wp, Cp)[:, :, :W, :cout]


# --------------------------------------------------------------------------
# Kernel 2: tiled matmul + bias + LeakyReLU (+ residual), K-reduction grid axis.
# Used for 1x1 convs (plain reshape) and the few stride-2 im2col convs.
# --------------------------------------------------------------------------
def _mm_bias_lrelu_kernel(*refs, use_res):
    if use_res:
        p_ref, w_ref, b_ref, r_ref, o_ref, acc_ref = refs
    else:
        p_ref, w_ref, b_ref, o_ref, acc_ref = refs
        r_ref = None
    k = pl.program_id(1)

    @pl.when(k == 0)
    def _():
        acc_ref[...] = jnp.zeros_like(acc_ref)

    acc_ref[...] += jnp.dot(p_ref[...], w_ref[...],
                            preferred_element_type=jnp.float32)

    @pl.when(k == pl.num_programs(1) - 1)
    def _():
        y = acc_ref[...] + b_ref[...]
        y = jnp.where(y > 0, y, 0.1 * y)                     # LeakyReLU(0.1), f32
        if use_res:
            y = y + r_ref[...].astype(jnp.float32)
        o_ref[...] = y.astype(o_ref.dtype)


def matmul_bias_lrelu(patches, w2d, bias, residual=None):
    """patches: [M,K] bf16, w2d: [K,Cp] bf16 (scale folded), bias: [1,Cp] f32,
    residual: [M,Cp] bf16 or None.  Returns [M,Cp] bf16."""
    M, K = patches.shape
    Cp = w2d.shape[1]

    TM = 256 if M >= 2048 else 128              # larger tiles when M is big
    Mp = _round_up(M, TM)
    if Mp != M:                                 # cdiv-style padding, no giant block
        patches = jnp.pad(patches, ((0, Mp - M), (0, 0)))
        if residual is not None:
            residual = jnp.pad(residual, ((0, Mp - M), (0, 0)))

    if K > 512:                                 # K-tiling keeps VMEM bounded (v7x)
        TK = 512
        Kp = _round_up(K, TK)
        patches = jnp.pad(patches, ((0, 0), (0, Kp - K)))
        w2d = jnp.pad(w2d, ((0, Kp - K), (0, 0)))
    else:
        TK, Kp = K, K

    grid = (Mp // TM, Kp // TK)
    in_specs = [
        pl.BlockSpec((TM, TK), lambda i, k: (i, k)),
        pl.BlockSpec((TK, Cp), lambda i, k: (k, 0)),
        pl.BlockSpec((1, Cp), lambda i, k: (0, 0)),
    ]
    args = [patches, w2d, bias]
    if residual is not None:
        in_specs.append(pl.BlockSpec((TM, Cp), lambda i, k: (i, 0)))
        args.append(residual)
    out_spec = pl.BlockSpec((TM, Cp), lambda i, k: (i, 0))

    est = 2 * (TM * TK * 2 + TK * Cp * 2 + 2 * TM * Cp * 2) + TM * Cp * 4
    kernel = functools.partial(_mm_bias_lrelu_kernel, use_res=residual is not None)
    out = pl.pallas_call(
        kernel,
        out_shape=jax.ShapeDtypeStruct((Mp, Cp), jnp.bfloat16),
        grid_spec=pltpu.PrefetchScalarGridSpec(
            num_scalar_prefetch=0,
            grid=grid,
            in_specs=in_specs,
            out_specs=out_spec,
            scratch_shapes=[pltpu.VMEM((TM, Cp), jnp.float32)],
        ),
        compiler_params=_compiler_params(est, ("parallel", "arbitrary")),
    )(*args)
    return out[:M]


# ------------------------------- JAX glue ---------------------------------
def _im2col(x, kh, kw, stride, padding):
    """x: [N,H,W,C] -> patches [N*Ho*Wo, kh*kw*C] (kh-major, kw, c)."""
    N, H, W, C = x.shape
    xp = jnp.pad(x, ((0, 0), (padding, padding), (padding, padding), (0, 0)))
    Ho = (H + 2 * padding - kh) // stride + 1
    Wo = (W + 2 * padding - kw) // stride + 1
    cols = []
    for i in range(kh):
        for j in range(kw):
            cols.append(xp[:, i:i + (Ho - 1) * stride + 1:stride,
                              j:j + (Wo - 1) * stride + 1:stride, :])
    patches = jnp.concatenate(cols, axis=-1)
    return patches.reshape(N * Ho * Wo, kh * kw * C), (N, Ho, Wo)


def _res2d(residual, Cp):
    if residual is None:
        return None
    N, H, W, C = residual.shape
    r = jnp.pad(residual.astype(jnp.bfloat16),
                ((0, 0), (0, 0), (0, 0), (0, Cp - C)))
    return r.reshape(N * H * W, Cp)


def conv_bn_lrelu(x, p, stride, residual=None):
    """x: [N,H,W,Cin] NHWC (bf16). p: {'w':[KH,KW,Cin,Cp] bf16 folded,
    'bias':[1,Cp] f32, 'cout': int}.  Returns [N,Ho,Wo,cout] bf16."""
    w, bias, cout = p["w"], p["bias"], p["cout"]
    KH, KW, Cin, Cp = w.shape
    N, H, W, _ = x.shape
    pad = (KH - 1) // 2
    x = x.astype(jnp.bfloat16)

    if KH == 1 and KW == 1 and stride == 1:          # 1x1: plain reshape, no im2col
        out2d = matmul_bias_lrelu(x.reshape(N * H * W, Cin),
                                  w.reshape(Cin, Cp), bias, _res2d(residual, Cp))
        return out2d.reshape(N, H, W, Cp)[..., :cout]

    if stride == 1:                                  # fused 3x3 stride-1 conv
        return _conv3x3_s1_fused(x, w, bias, cout, residual)

    # stride-2 downsample convs (few of them): im2col + tiled matmul kernel
    patches, (N, Ho, Wo) = _im2col(x, KH, KW, stride, pad)
    out2d = matmul_bias_lrelu(patches, w.reshape(KH * KW * Cin, Cp), bias,
                              _res2d(residual, Cp))
    return out2d.reshape(N, Ho, Wo, Cp)[..., :cout]


# ------------------------- deterministic parameters ------------------------
def init_convbn(key, ch_in, ch_out, k):
    kw_, kg, kb, km, kv = jax.random.split(key, 5)
    fan_in = k * k * ch_in
    w = jax.random.normal(kw_, (k, k, ch_in, ch_out), jnp.float32) / jnp.sqrt(
        jnp.float32(fan_in))
    gamma = 1.0 + 0.1 * jax.random.normal(kg, (ch_out,), jnp.float32)
    beta = 0.1 * jax.random.normal(kb, (ch_out,), jnp.float32)
    running_mean = 0.1 * jax.random.normal(km, (ch_out,), jnp.float32)
    running_var = 1.0 + 0.1 * jnp.abs(jax.random.normal(kv, (ch_out,), jnp.float32))
    eps = 1e-5
    scale = gamma / jnp.sqrt(running_var + eps)
    bias = beta - running_mean * scale
    return {"w": w, "scale": scale.reshape(1, ch_out), "bias": bias.reshape(1, ch_out)}


def _prep_convbn(p):
    """Fold BN scale into conv weights, pad Cout to a lane multiple, cast bf16."""
    w, scale, bias = p["w"], p["scale"], p["bias"]
    KH, KW, Cin, Cout = w.shape
    Cp = _round_up(Cout, LANE)
    wf = w * scale.reshape(1, 1, 1, Cout)
    wf = jnp.pad(wf, ((0, 0), (0, 0), (0, 0), (0, Cp - Cout))).astype(jnp.bfloat16)
    bf = jnp.pad(bias.reshape(1, Cout), ((0, 0), (0, Cp - Cout))).astype(jnp.float32)
    return {"w": wf, "bias": bf, "cout": Cout}


def init_darknet(key, num_blocks, start_nf=8):
    params = {}
    nf = start_nf
    key, kb = jax.random.split(key)
    params["base"] = init_convbn(kb, 3, nf, 3)          # ConvBN(3, nf, k=3, s=1)
    layers = []
    for nb in num_blocks:
        key, kd = jax.random.split(key)
        layer = [init_convbn(kd, nf, nf * 2, 3)]        # ConvBN(nf, 2nf, k=3, s=2)
        for _ in range(nb):
            key, k1, k2 = jax.random.split(key, 3)
            layer.append({
                "conv1": init_convbn(k1, nf * 2, nf, 1),   # 1x1, pad 0
                "conv2": init_convbn(k2, nf, nf * 2, 3),   # 3x3, pad 1
            })
        layers.append(layer)
        nf *= 2
    params["layers"] = layers
    return params


def prep_darknet(raw):
    out = {"base": _prep_convbn(raw["base"]), "layers": []}
    for layer in raw["layers"]:
        prepped = [_prep_convbn(layer[0])]
        for blk in layer[1:]:
            prepped.append({"conv1": _prep_convbn(blk["conv1"]),
                            "conv2": _prep_convbn(blk["conv2"])})
        out["layers"].append(prepped)
    return out


# ------------------------------- forward pass ------------------------------
def darknet_forward(params, x_nchw):
    """Returns y = [base(x), layer0(...), layer1(...), ...] in NCHW (f32)."""
    x = jnp.transpose(x_nchw, (0, 2, 3, 1)).astype(jnp.bfloat16)   # NCHW -> NHWC
    y = [conv_bn_lrelu(x, params["base"], stride=1)]
    for layer in params["layers"]:
        h = conv_bn_lrelu(y[-1], layer[0], stride=2)               # downsample
        for blk in layer[1:]:                                      # DarknetBlocks
            t = conv_bn_lrelu(h, blk["conv1"], stride=1)
            h = conv_bn_lrelu(t, blk["conv2"], stride=1, residual=h)
        y.append(h)
    return [jnp.transpose(t, (0, 3, 1, 2)).astype(jnp.float32) for t in y]


if __name__ == "__main__":
    key = jax.random.PRNGKey(0)
    kx, kp = jax.random.split(key)

    # Small Darknet: num_blocks=(1, 1), start_nf=8, input [2, 3, 16, 16] (NCHW).
    num_blocks = (1, 1)
    start_nf = 8
    raw_params = init_darknet(kp, num_blocks, start_nf=start_nf)
    params = prep_darknet(raw_params)
    x = jax.random.normal(kx, (2, 3, 16, 16), jnp.float32)

    outs = darknet_forward(params, x)
    outs = [jax.block_until_ready(o) for o in outs]

    expected_shapes = [(2, 8, 16, 16), (2, 16, 8, 8), (2, 32, 4, 4)]
    assert [tuple(o.shape) for o in outs] == expected_shapes, \
        [tuple(o.shape) for o in outs]
    assert all(bool(jnp.isfinite(o).all()) for o in outs)
    print("KERNEL_OK")
</pallas_src>

<mosaic_0001>
module attributes {stable_mosaic.version = 11 : i64} {
  func.func @_conv3x3_kernel(%arg0: i32, %arg1: memref<1x326x3xbf16, #tpu.memory_space<vmem>>, %arg2: memref<9x3x128xbf16, #tpu.memory_space<vmem>>, %arg3: memref<1x128xf32, #tpu.memory_space<vmem>>, %arg4: memref<1x288x128xbf16, #tpu.memory_space<vmem>>) attributes {dimension_semantics = [#tpu.dimension_semantics<parallel>], iteration_bounds = array<i64: 2>, scalar_prefetch = 0 : i64, scratch_operands = 0 : i64, tpu.core_type = #tpu.core_type<tc>, window_params = [{transform_indices = @transform_0, window_bounds = array<i64: 1, 326, 3>}, {pipeline_mode = #tpu.pipeline_mode<synchronous>, transform_indices = @transform_1, window_bounds = array<i64: 9, 3, 128>}, {pipeline_mode = #tpu.pipeline_mode<synchronous>, transform_indices = @transform_2, window_bounds = array<i64: 1, 128>}, {transform_indices = @transform_3, window_bounds = array<i64: 1, 288, 128>}]} {
    %cst = arith.constant 0.000000e+00 : f32
    %0 = vector.broadcast %cst : f32 to vector<288x128xf32>
    %c0 = arith.constant 0 : index
    %c0_0 = arith.constant 0 : index
    %c0_1 = arith.constant 0 : index
    %1 = vector.load %arg1[%c0, %c0_0, %c0_1] : memref<1x326x3xbf16, #tpu.memory_space<vmem>>, vector<1x288x3xbf16>
    %2 = vector.shape_cast %1 : vector<1x288x3xbf16> to vector<288x3xbf16>
    %c0_2 = arith.constant 0 : index
    %c0_3 = arith.constant 0 : index
    %c0_4 = arith.constant 0 : index
    %3 = vector.load %arg2[%c0_2, %c0_3, %c0_4] : memref<9x3x128xbf16, #tpu.memory_space<vmem>>, vector<1x3x128xbf16>
    %4 = vector.shape_cast %3 : vector<1x3x128xbf16> to vector<3x128xbf16>
    %cst_5 = arith.constant dense<0.000000e+00> : vector<288x128xf32>
    %5 = tpu.matmul %2, %4, %cst_5 {dimension_numbers = #tpu.dot_dimension_numbers<[1], [0], [0], [1], [0, 0, 1, 1], [], []>} : vector<288x3xbf16>, vector<3x128xbf16>, vector<288x128xf32> -> vector<288x128xf32>
    %6 = arith.addf %0, %5 : vector<288x128xf32>
    %c0_6 = arith.constant 0 : index
    %c1 = arith.constant 1 : index
    %c0_7 = arith.constant 0 : index
    %7 = vector.load %arg1[%c0_6, %c1, %c0_7] : memref<1x326x3xbf16, #tpu.memory_space<vmem>>, vector<1x288x3xbf16>
    %8 = vector.shape_cast %7 : vector<1x288x3xbf16> to vector<288x3xbf16>
    %c1_8 = arith.constant 1 : index
    %c0_9 = arith.constant 0 : index
    %c0_10 = arith.constant 0 : index
    %9 = vector.load %arg2[%c1_8, %c0_9, %c0_10] : memref<9x3x128xbf16, #tpu.memory_space<vmem>>, vector<1x3x128xbf16>
    %10 = vector.shape_cast %9 : vector<1x3x128xbf16> to vector<3x128xbf16>
    %cst_11 = arith.constant dense<0.000000e+00> : vector<288x128xf32>
    %11 = tpu.matmul %8, %10, %cst_11 {dimension_numbers = #tpu.dot_dimension_numbers<[1], [0], [0], [1], [0, 0, 1, 1], [], []>} : vector<288x3xbf16>, vector<3x128xbf16>, vector<288x128xf32> -> vector<288x128xf32>
    %12 = arith.addf %6, %11 : vector<288x128xf32>
    %c0_12 = arith.constant 0 : index
    %c2 = arith.constant 2 : index
    %c0_13 = arith.constant 0 : index
    %13 = vector.load %arg1[%c0_12, %c2, %c0_13] : memref<1x326x3xbf16, #tpu.memory_space<vmem>>, vector<1x288x3xbf16>
    %14 = vector.shape_cast %13 : vector<1x288x3xbf16> to vector<288x3xbf16>
    %c2_14 = arith.constant 2 : index
    %c0_15 = arith.constant 0 : index
    %c0_16 = arith.constant 0 : index
    %15 = vector.load %arg2[%c2_14, %c0_15, %c0_16] : memref<9x3x128xbf16, #tpu.memory_space<vmem>>, vector<1x3x128xbf16>
    %16 = vector.shape_cast %15 : vector<1x3x128xbf16> to vector<3x128xbf16>
    %cst_17 = arith.constant dense<0.000000e+00> : vector<288x128xf32>
    %17 = tpu.matmul %14, %16, %cst_17 {dimension_numbers = #tpu.dot_dimension_numbers<[1], [0], [0], [1], [0, 0, 1, 1], [], []>} : vector<288x3xbf16>, vector<3x128xbf16>, vector<288x128xf32> -> vector<288x128xf32>
    %18 = arith.addf %12, %17 : vector<288x128xf32>
    %c0_18 = arith.constant 0 : index
    %c18 = arith.constant 18 : index
    %c0_19 = arith.constant 0 : index
    %19 = vector.load %arg1[%c0_18, %c18, %c0_19] : memref<1x326x3xbf16, #tpu.memory_space<vmem>>, vector<1x288x3xbf16>
    %20 = vector.shape_cast %19 : vector<1x288x3xbf16> to vector<288x3xbf16>
    %c3 = arith.constant 3 : index
    %c0_20 = arith.constant 0 : index
    %c0_21 = arith.constant 0 : index
    %21 = vector.load %arg2[%c3, %c0_20, %c0_21] : memref<9x3x128xbf16, #tpu.memory_space<vmem>>, vector<1x3x128xbf16>
    %22 = vector.shape_cast %21 : vector<1x3x128xbf16> to vector<3x128xbf16>
    %cst_22 = arith.constant dense<0.000000e+00> : vector<288x128xf32>
    %23 = tpu.matmul %20, %22, %cst_22 {dimension_numbers = #tpu.dot_dimension_numbers<[1], [0], [0], [1], [0, 0, 1, 1], [], []>} : vector<288x3xbf16>, vector<3x128xbf16>, vector<288x128xf32> -> vector<288x128xf32>
    %24 = arith.addf %18, %23 : vector<288x128xf32>
    %c0_23 = arith.constant 0 : index
    %c19 = arith.constant 19 : index
    %c0_24 = arith.constant 0 : index
    %25 = vector.load %arg1[%c0_23, %c19, %c0_24] : memref<1x326x3xbf16, #tpu.memory_space<vmem>>, vector<1x288x3xbf16>
    %26 = vector.shape_cast %25 : vector<1x288x3xbf16> to vector<288x3xbf16>
    %c4 = arith.constant 4 : index
    %c0_25 = arith.constant 0 : index
    %c0_26 = arith.constant 0 : index
    %27 = vector.load %arg2[%c4, %c0_25, %c0_26] : memref<9x3x128xbf16, #tpu.memory_space<vmem>>, vector<1x3x128xbf16>
    %28 = vector.shape_cast %27 : vector<1x3x128xbf16> to vector<3x128xbf16>
    %cst_27 = arith.constant dense<0.000000e+00> : vector<288x128xf32>
    %29 = tpu.matmul %26, %28, %cst_27 {dimension_numbers = #tpu.dot_dimension_numbers<[1], [0], [0], [1], [0, 0, 1, 1], [], []>} : vector<288x3xbf16>, vector<3x128xbf16>, vector<288x128xf32> -> vector<288x128xf32>
    %30 = arith.addf %24, %29 : vector<288x128xf32>
    %c0_28 = arith.constant 0 : index
    %c20 = arith.constant 20 : index
    %c0_29 = arith.constant 0 : index
    %31 = vector.load %arg1[%c0_28, %c20, %c0_29] : memref<1x326x3xbf16, #tpu.memory_space<vmem>>, vector<1x288x3xbf16>
    %32 = vector.shape_cast %31 : vector<1x288x3xbf16> to vector<288x3xbf16>
    %c5 = arith.constant 5 : index
    %c0_30 = arith.constant 0 : index
    %c0_31 = arith.constant 0 : index
    %33 = vector.load %arg2[%c5, %c0_30, %c0_31] : memref<9x3x128xbf16, #tpu.memory_space<vmem>>, vector<1x3x128xbf16>
    %34 = vector.shape_cast %33 : vector<1x3x128xbf16> to vector<3x128xbf16>
    %cst_32 = arith.constant dense<0.000000e+00> : vector<288x128xf32>
    %35 = tpu.matmul %32, %34, %cst_32 {dimension_numbers = #tpu.dot_dimension_numbers<[1], [0], [0], [1], [0, 0, 1, 1], [], []>} : vector<288x3xbf16>, vector<3x128xbf16>, vector<288x128xf32> -> vector<288x128xf32>
    %36 = arith.addf %30, %35 : vector<288x128xf32>
    %c0_33 = arith.constant 0 : index
    %c36 = arith.constant 36 : index
    %c0_34 = arith.constant 0 : index
    %37 = vector.load %arg1[%c0_33, %c36, %c0_34] : memref<1x326x3xbf16, #tpu.memory_space<vmem>>, vector<1x288x3xbf16>
    %38 = vector.shape_cast %37 : vector<1x288x3xbf16> to vector<288x3xbf16>
    %c6 = arith.constant 6 : index
    %c0_35 = arith.constant 0 : index
    %c0_36 = arith.constant 0 : index
    %39 = vector.load %arg2[%c6, %c0_35, %c0_36] : memref<9x3x128xbf16, #tpu.memory_space<vmem>>, vector<1x3x128xbf16>
    %40 = vector.shape_cast %39 : vector<1x3x128xbf16> to vector<3x128xbf16>
    %cst_37 = arith.constant dense<0.000000e+00> : vector<288x128xf32>
    %41 = tpu.matmul %38, %40, %cst_37 {dimension_numbers = #tpu.dot_dimension_numbers<[1], [0], [0], [1], [0, 0, 1, 1], [], []>} : vector<288x3xbf16>, vector<3x128xbf16>, vector<288x128xf32> -> vector<288x128xf32>
    %42 = arith.addf %36, %41 : vector<288x128xf32>
    %c0_38 = arith.constant 0 : index
    %c37 = arith.constant 37 : index
    %c0_39 = arith.constant 0 : index
    %43 = vector.load %arg1[%c0_38, %c37, %c0_39] : memref<1x326x3xbf16, #tpu.memory_space<vmem>>, vector<1x288x3xbf16>
    %44 = vector.shape_cast %43 : vector<1x288x3xbf16> to vector<288x3xbf16>
    %c7 = arith.constant 7 : index
    %c0_40 = arith.constant 0 : index
    %c0_41 = arith.constant 0 : index
    %45 = vector.load %arg2[%c7, %c0_40, %c0_41] : memref<9x3x128xbf16, #tpu.memory_space<vmem>>, vector<1x3x128xbf16>
    %46 = vector.shape_cast %45 : vector<1x3x128xbf16> to vector<3x128xbf16>
    %cst_42 = arith.constant dense<0.000000e+00> : vector<288x128xf32>
    %47 = tpu.matmul %44, %46, %cst_42 {dimension_numbers = #tpu.dot_dimension_numbers<[1], [0], [0], [1], [0, 0, 1, 1], [], []>} : vector<288x3xbf16>, vector<3x128xbf16>, vector<288x128xf32> -> vector<288x128xf32>
    %48 = arith.addf %42, %47 : vector<288x128xf32>
    %c0_43 = arith.constant 0 : index
    %c38 = arith.constant 38 : index
    %c0_44 = arith.constant 0 : index
    %49 = vector.load %arg1[%c0_43, %c38, %c0_44] : memref<1x326x3xbf16, #tpu.memory_space<vmem>>, vector<1x288x3xbf16>
    %50 = vector.shape_cast %49 : vector<1x288x3xbf16> to vector<288x3xbf16>
    %c8 = arith.constant 8 : index
    %c0_45 = arith.constant 0 : index
    %c0_46 = arith.constant 0 : index
    %51 = vector.load %arg2[%c8, %c0_45, %c0_46] : memref<9x3x128xbf16, #tpu.memory_space<vmem>>, vector<1x3x128xbf16>
    %52 = vector.shape_cast %51 : vector<1x3x128xbf16> to vector<3x128xbf16>
    %cst_47 = arith.constant dense<0.000000e+00> : vector<288x128xf32>
    %53 = tpu.matmul %50, %52, %cst_47 {dimension_numbers = #tpu.dot_dimension_numbers<[1], [0], [0], [1], [0, 0, 1, 1], [], []>} : vector<288x3xbf16>, vector<3x128xbf16>, vector<288x128xf32> -> vector<288x128xf32>
    %54 = arith.addf %48, %53 : vector<288x128xf32>
    %c0_48 = arith.constant 0 : index
    %c0_49 = arith.constant 0 : index
    %55 = vector.load %arg3[%c0_48, %c0_49] : memref<1x128xf32, #tpu.memory_space<vmem>>, vector<1x128xf32>
    %56 = vector.broadcast %55 : vector<1x128xf32> to vector<288x128xf32>
    %57 = arith.addf %54, %56 : vector<288x128xf32>
    %cst_50 = arith.constant 0.000000e+00 : f32
    %58 = vector.broadcast %cst_50 : f32 to vector<288x128xf32>
    %59 = arith.cmpf ogt, %57, %58 : vector<288x128xf32>
    %cst_51 = arith.constant 1.000000e-01 : f32
    %60 = vector.broadcast %cst_51 : f32 to vector<288x128xf32>
    %61 = arith.mulf %60, %57 : vector<288x128xf32>
    %62 = arith.select %59, %57, %61 : vector<288x128xi1>, vector<288x128xf32>
    %63 = arith.truncf %62 : vector<288x128xf32> to vector<288x128xbf16>
    %c0_52 = arith.constant 0 : index
    %c0_53 = arith.constant 0 : index
    %c0_54 = arith.constant 0 : index
    %64 = vector.load %arg4[%c0_52, %c0_53, %c0_54] : memref<1x288x128xbf16, #tpu.memory_space<vmem>>, vector<1x288x128xbf16>
    %65 = vector.shape_cast %64 : vector<1x288x128xbf16> to vector<288x128xbf16>
    %66 = vector.shape_cast %63 : vector<288x128xbf16> to vector<1x288x128xbf16>
    tpu.vector_store %arg4[%c0_52, %c0_53, %c0_54], %66 {strides = array<i32>} : memref<1x288x128xbf16, #tpu.memory_space<vmem>>, vector<1x288x128xbf16>,
    return
  }
  func.func @transform_0(%arg0: i32) -> (i32, i32, i32) {
    %c0_i32 = arith.constant 0 : i32
    %c0_i32_0 = arith.constant 0 : i32
    %c0_i32_1 = arith.constant 0 : i32
    return %arg0, %c0_i32, %c0_i32_0 : i32, i32, i32
  }
  func.func @transform_1(%arg0: i32) -> (i32, i32, i32) {
    %c0_i32 = arith.constant 0 : i32
    %c0_i32_0 = arith.constant 0 : i32
    %c0_i32_1 = arith.constant 0 : i32
    %c0_i32_2 = arith.constant 0 : i32
    return %c0_i32, %c0_i32_0, %c0_i32_1 : i32, i32, i32
  }
  func.func @transform_2(%arg0: i32) -> (i32, i32) {
    %c0_i32 = arith.constant 0 : i32
    %c0_i32_0 = arith.constant 0 : i32
    %c0_i32_1 = arith.constant 0 : i32
    return %c0_i32, %c0_i32_0 : i32, i32
  }
  func.func @transform_3(%arg0: i32) -> (i32, i32, i32) {
    %c0_i32 = arith.constant 0 : i32
    %c0_i32_0 = arith.constant 0 : i32
    %c0_i32_1 = arith.constant 0 : i32
    return %arg0, %c0_i32, %c0_i32_0 : i32, i32, i32
  }
}

</mosaic_0001>

<bundles_post_ra>
// kernel: tpu_custom_call.1
= control target key start
LH: loop header
LB: loop body
LE: loop exit
PB: predicated region body
PF: predicated region fallthrough
CT: control target
= control target key end

     0   :  { %8 = vsyncpa [#allocation3], 0  ;;  %s6457_s0 = inlined_call_operand.vmem [shape: bf16[2,326,3], index: 0, kind: input, shape index: {}]   ;;  %s6458_s1 = inlined_call_operand.vmem [shape: bf16[9,3,128], index: 1, kind: input, shape index: {}]   ;;  %s6459_s2 = inlined_call_operand.vmem [shape: f32[1,128], index: 2, kind: input, shape index: {}]   ;;  %s6460_s3 = inlined_call_operand.hbm [shape: bf16[2,288,128], index: 3, kind: output, shape index: {}]  }
   0x1   :  { %10 = vsyncpa [#allocation3 + $0x1], 0  ;;  %s5456_s12 = smov 0   ;;  %s5458_s13 = smov 0  }
   0x2   :  { %s5460_s14 = smov 0   ;;  %s5462_s15 = smov 0  }
   0x3 LB: > { %s5477_s16 = sadd.s32 4294967295, %s5430_s15   ;;  %s4028_s17 = sadd.s32 4294967294, %s5430_s15   ;;  %s5430_s15 = sphi %s5462_s15, %s6466_s15   ;;  %s5426_s14 = sphi %s5460_s14, %s6465_s14   ;;  %s5422_s13 = sphi %s5458_s13, %s6464_s13   ;;  %s5418_s12 = sphi %s5456_s12, %s6463_s12  }
   0x4   : > { %s5481_s18 = sadd.s32 1, %s5430_s15   ;;  %s91_s19 = sadd.s32 1, %s5426_s14 }
   0x5   : > { %s88_s20 = ssub.s32 %s5430_s15, %s5481_s18  ;;  %p101_p0 = scmp.ne.s32.totalorder %s5426_s14, %s5422_s13 }
   0x6   : > { %p89_p1 = scmp.eq.s32.totalorder %s88_s20, 0  ;;  %p102_p2 = scmp.eq.s32.totalorder %s5477_s16, 1 }
   0x7   : > { %p107_p3 = scmp.ne.s32.totalorder %s5422_s13, %s5418_s12  ;;  %p108_p4 = scmp.eq.s32.totalorder %s4028_s17, 1 }
   0x8   : > { %s5492_s21 = scalar_select %p89_p1, %s5426_s14, %s91_s19  }
   0x9   : > { %p5494_p5 = por %p102_p2, %p101_p0  ;;  %p5498_p6 = por %p108_p4, %p107_p3 }
   0xa   : > { %p4031_p7 = scmp.ge.s32.totalorder %s5430_s15, 1  ;;  %p140_p8 = scmp.lt.s32.totalorder %s5430_s15, 3 }
   0xc   : > { %p141_p9 = pnand %p4031_p7, %p140_p8 }
   0xd   : > { %vm507_vm0 = vcmask (!%p141_p9), 1040384   ;;  %vm508_vm1 = vcmask (!%p141_p9), 1041408   ;;  %v4147_v0 = vld [vmem:[%s6458_s1 + $0x8] sm:$0x3] (!%p141_p9)  ;;  %p164_p10 = scmp.lt.s32.totalorder (!%p141_p9), %s5477_s16, 1  ;;  %v5432_v1 = vmov (!%p141_p9), 65535  }
   0xe   : > { %144 = sbr.rel (%p141_p9) target bundleno = 599 (0x257), region = 32  ;;  %v509_v2 = vsel (!%p141_p9), %vm507_vm0, 4294967295, %v5432_v1  ;;  %v4033_v3 = vld [vmem:[%s6458_s1 + $0x2] sm:$0x3] (!%p141_p9)  ;;  %v4167_v5 = vld [vmem:[%s6458_s1 + $0xa] sm:$0x3] (!%p141_p9) }
   0xf   : > { %v5511_v4 = vsel (!%p141_p9), %vm508_vm1, %v509_v2, 0  ;;  %v206_v9 = vld [vmem:[%s6458_s1] sm:$0x3] (!%p141_p9)  ;;  %vm303_vm2 = vsmask.f32 (!%p141_p9), 7424  ;;  %vm452_vm3 = vcmask (!%p141_p9), 23552  }
  0x10   : > { %v5518_v6 = vand.u32 (!%p141_p9), %v4147_v0, %v5511_v4  ;;  %v512_v7 = vand.u32 (!%p141_p9), %v4033_v3, %v5511_v4  ;;  %v5522_v8 = vand.u32 (!%p141_p9), %v4167_v5, %v5511_v4  ;;  %v5528_v10 = vand.u32 (!%p141_p9), %v5511_v4, %v206_v9  ;;  %v4187_v11 = vld [vmem:[%s6458_s1 + $0xc] sm:$0x3] (!%p141_p9)  ;;  %v4089_v17 = vld [vmem:[%s6458_s1 + $0x4] sm:$0x3] (!%p141_p9)  ;;  %s161_s4 = sand.u32 (!%p141_p9), 1, %s5422_s13   ;;  %s5253_s7 = smul.u32 (!%p141_p9), 2304, %s5477_s16 }
  0x11   : > { %vm1666_vm4 = vsmask.f32 (!%p141_p9), 6400  ;;  %v5573_v26 = vand.u32 (!%p141_p9), %v4187_v11, %v5511_v4  ;;  %v5584_v35 = vand.u32 (!%p141_p9), %v4089_v17, %v5511_v4  ;;  %vm2113_vm5 = vcmask (!%p141_p9), 1045504   ;;  %s5251_s5 = smul.u32 (!%p141_p9), 144, %s161_s4  ;;  %s5433_s19 = smov (!%p141_p9), [#allocation2]  }
  0x12   : > { %4771 = vmatprep.subr.bf16.mxu0 (!%p141_p9), %v5518_v6  ;;  %4619 = vmatprep.subr.bf16.mxu1 (!%p141_p9), %v512_v7  ;;  %vm913_vm6 = vcmask (!%p141_p9), 1046528   ;;  %vm2866_vm7 = vsmask.f32 (!%p141_p9), 5376  ;;  %vm3313_vm8 = vcmask (!%p141_p9), 1044480   ;;  %s6408_s11 = scalar_lea.hbm (!%p141_p9), %s6460_s3, %s5253_s7  ;;  %s5372_s20 = sshll.u32 (!%p141_p9), %s5433_s19, 4  ;;  %s5373_s20 = int_to_ptr.vmem [resolvable:$false] %s5372_s20 }
  0x13   : > { %4772 = vmatpush3.bf16.msra.mxu0 (!%p141_p9), %v5518_v6  ;;  %4620 = vmatpush3.bf16.msra.mxu1 (!%p141_p9), %v512_v7  ;;  %s5374_s24 = scalar_lea.vmem (!%p141_p9), %s5373_s20, 4608 }
  0x14   : > { %4809 = vmatprep.subr.bf16.mxu0 (!%p141_p9), %v5522_v8  ;;  %4657 = vmatprep.subr.bf16.mxu1 (!%p141_p9), %v5528_v10 }
  0x15   : > { %s165_s28 = scalar_select %p164_p10, %s5477_s16, 1 }
  0x16   : > { %s6416_s16 = scalar_lea.sflag [#allocation3], %s161_s4 }
  0x17   : > { %s5252_s6 = smul.u32 164, %s165_s28 }
  0x19   : > { %s5535_s9 = scalar_lea.vmem %s6457_s0, %s5252_s6  ;;  %s6342_s6 = scalar_lea.vmem [#allocation2], %s5251_s5 }
  0x1a   : > { %v170_v12 = vld [vmem:[%s5535_s9] sm:$0xf]  ;;  %v5542_v13 = vld [vmem:[%s5535_s9 + $0x4] sm:$0xf]  ;;  %v5550_v15 = vld [vmem:[%s5535_s9 + $0x8] sm:$0xff]   ;;  %s3966_s8 = sshll.u32 %s6342_s6, 4  ;;  %s6410_s8 = int_to_ptr.vmem [resolvable:$true] %s3966_s8 }
  0x1b   : > { %v5547_v14 = vcombine.low %v170_v12, %v5542_v13  ;;  %v1221_v16 = vld [vmem:[%s5535_s9 + $0x8] sm:$0xe]  ;;  %v5557_v18 = vld [vmem:[%s5535_s9 + $0xc] sm:$0xf]  ;;  %v312_v21 = vshll.u32 %v5550_v15, 16  ;;  %v316_v22 = vshrl.u32 %v5550_v15, 16  ;;  %p5375_p0 = scmp.lt.s32.totalorder %s6410_s8, %s5373_s20 }
  0x1c   : > { %v5564_v23 = vld [vmem:[%s5535_s9 + $0x10] sm:$0xff]   ;;  %v5570_v25 = vcombine.low %v1221_v16, %v5557_v18  ;;  %v5581_v34 = vld [vmem:[%s5535_s9 + $0x18] sm:$0xff]   ;;  %v5590_v41 = vld [vmem:[%s5535_s9 + $0x20] sm:$0xff]   ;;  %s5368_s17 = scalar_lea.vmem %s6410_s8, 2304 }
  0x1d   : > { %v305_v19 = vshrl.u32 %v5547_v14, 16  ;;  %v307_v20 = vshll.u32 %v5547_v14, 16  ;;  %v5567_v24 = vld [vmem:[%s5535_s9 + $0x10] sm:$0xff]   ;;  %v314_v28 = vrot.slane %v312_v21, 1  ;;  %v1676_v29 = vshrl.u32 %v5564_v23, 16  ;;  %v5587_v40 = vld [vmem:[%s5535_s9 + $0x18] sm:$0xff]   ;;  %p5369_p11 = scmp.ne.s32.totalorder %s6410_s8, %s5368_s17  ;;  %p5376_p1 = scmp.lt.s32.totalorder %s5374_s24, %s5368_s17 }
  0x1e   : > { %v1679_v30 = vshll.u32 %v5564_v23, 16  ;;  %v1668_v31 = vshrl.u32 %v5570_v25, 16  ;;  %v1671_v32 = vshll.u32 %v5570_v25, 16  ;;  %v320_v33 = vshll.u32 %v5567_v24, 16  ;;  %v5600_v54 = vld [vmem:[%s5535_s9 + $0x20] sm:$0xff]   ;;  %v5603_v55 = vld [vmem:[%s5535_s9 + $0x28] sm:$0xff]  }
  0x1f   : > { %v309_v27 = vrot.slane %v307_v20, 1  ;;  %v318_v37 = vor.u32 %v316_v22, %v314_v28  ;;  %v1678_v38 = vrot.slane %v1676_v29, 1  ;;  %v1685_v45 = vshrl.u32 %v5581_v34, 16  ;;  %v5609_v60 = vld [vmem:[%s5535_s9 + $0x28] sm:$0xff]   ;;  %v5616_v1 = vld [vmem:[%s5535_s9 + $0x30] sm:$0xff]   ;;  %p5370_p12 = pnand %p5369_p11, %p5494_p5  ;;  %p5377_p2 = por %p5376_p1, %p5375_p0 }
  0x20   : > { %v1681_v39 = vrot.slane %v1679_v30, 2  ;;  %v1670_v42 = vrot.slane %v1668_v31, 1  ;;  %v1673_v43 = vrot.slane %v1671_v32, 2  ;;  %v322_v44 = vrot.slane %v320_v33, 1  ;;  %v5621_v9 = vld [vmem:[%s5535_s9 + $0x30] sm:$0xff]   ;;  %v5634_v30 = vld [vmem:[%s5535_s9 + $0x38] sm:$0xff]  }
  0x21   : > { %v310_v36 = vor.u32 %v309_v27, %v305_v19  ;;  %v1688_v48 = vshll.u32 %v5581_v34, 16  ;;  %v324_v49 = vshrl.u32 %v5567_v24, 16  ;;  %v1687_v52 = vrot.slane %v1685_v45, 1  ;;  %p5371_p13 = pneg %p5370_p12 }
  0x22   : > { %v1682_v47 = vor.u32 %v1681_v39, %v1678_v38  ;;  %v1674_v50 = vor.u32 %v1673_v43, %v1670_v42  ;;  %v323_v51 = vsel %vm303_vm2, %v318_v37, %v322_v44  ;;  %v328_v53 = vshll.u32 %v5587_v40, 16  ;;  %v5643_v43 = vld [vmem:[%s5535_s9 + $0x38] sm:$0xff]  }
  0x23   : > { %v315_v46 = vsel %vm303_vm2, %v310_v36, %v314_v28  ;;  %v1690_v56 = vrot.slane %v1688_v48, 2  ;;  %v326_v57 = vor.u32 %v324_v49, %v322_v44  ;;  %v1694_v58 = vshrl.u32 %v5590_v41, 16  ;;  %p5378_p3 = pnand %p5377_p2, %p5371_p13 }
  0x24   : > { %4621 = vmatprep.mubr.msk.bf16.mxu1 %vm452_vm3, %v315_v46  ;;  %v1697_v59 = vshll.u32 %v5590_v41, 16  ;;  %v1683_v61 = vsel %vm1666_vm4, %v1674_v50, %v1682_v47  ;;  %v330_v62 = vrot.slane %v328_v53, 1  ;;  %v332_v63 = vshrl.u32 %v5587_v40, 16 }
  0x25   : > { %4622 = vmatmul.mubr.msk.bf16.vlgmr.msra.gmra.mrb[0].mxu1 %vm452_vm3, %v323_v51  ;;  %v336_v0 = vshll.u32 %v5600_v54, 16  ;;  %4773 = vmatprep.mubr.msk.bf16.mxu0 %vm452_vm3, %v1683_v61  ;;  %v1691_v2 = vor.u32 %v1690_v56, %v1687_v52  ;;  %v1696_v3 = vrot.slane %v1694_v58, 1  ;;  %v1703_v7 = vshrl.u32 %v5603_v55, 16  ;;  %v5653_v51 = vld [vmem:[%s5535_s9 + $0x40] sm:$0xff]  }
  0x26   : > { %4658 = vmatpush3.bf16.msra.mxu1 %v5528_v10  ;;  %v1699_v5 = vrot.slane %v1697_v59, 2  ;;  %v331_v11 = vsel %vm303_vm2, %v326_v57, %v330_v62  ;;  %v334_v12 = vor.u32 %v332_v63, %v330_v62  ;;  %v1706_v10 = vshll.u32 %v5603_v55, 16  ;;  %v5658_v58 = vld [vmem:[%s5535_s9 + $0x40] sm:$0xff]  }
  0x27   : > { %4695 = vmatprep.subr.bf16.mxu1 %v5584_v35  ;;  %v338_v16 = vrot.slane %v336_v0, 1  ;;  %v1692_v17 = vsel %vm1666_vm4, %v1682_v47, %v1691_v2  ;;  %4625 = vmatprep.mubr.msk.bf16.mxu1 %vm452_vm3, %v331_v11  ;;  %v1705_v20 = vrot.slane %v1703_v7, 1  ;;  %v340_v21 = vshrl.u32 %v5600_v54, 16  ;;  %v5666_v7 = vld [vmem:[%s5535_s9 + $0x48] sm:$0xff]  }
  0x28   : > { %v1700_v19 = vor.u32 %v1699_v5, %v1696_v3  ;;  %4774 = vmatmul.mubr.msk.bf16.vlgmr.msra.gmra.mrb[0].mxu0 %vm452_vm3, %v1692_v17  ;;  %v1708_v27 = vrot.slane %v1706_v10, 2  ;;  %v344_v28 = vshll.u32 %v5609_v60, 16  ;;  %v1712_v29 = vshrl.u32 %v5616_v1, 16  ;;  %v5669_v11 = vld [vmem:[%s5535_s9 + $0x48] sm:$0xff]  }
  0x29   : > { %v339_v22 = vsel %vm303_vm2, %v334_v12, %v338_v16  ;;  %4810 = vmatpush3.bf16.msra.mxu0 %v5522_v8  ;;  %v342_v32 = vor.u32 %v340_v21, %v338_v16  ;;  %v1715_v33 = vshll.u32 %v5616_v1, 16  ;;  %v348_v36 = vshrl.u32 %v5609_v60, 16  ;;  %v5678_v21 = vld [vmem:[%s5535_s9 + $0x50] sm:$0xff]  }
  0x2a   : > { %v1701_v31 = vsel %vm1666_vm4, %v1691_v2, %v1700_v19  ;;  %v1709_v37 = vor.u32 %v1708_v27, %v1705_v20  ;;  %v346_v38 = vrot.slane %v344_v28, 1  ;;  %v1714_v39 = vrot.slane %v1712_v29, 1  ;;  %4847 = vmatprep.subr.bf16.mxu0 %v5573_v26 }
  0x2b   : > { %4777 = vmatprep.mubr.msk.bf16.mxu0 %vm452_vm3, %v1701_v31  ;;  %v352_v42 = vshll.u32 %v5621_v9, 16  ;;  %v1717_v8 = vrot.slane %v1715_v33, 2  ;;  %v1721_v44 = vshrl.u32 %v5634_v30, 16  ;;  %v1724_v45 = vshll.u32 %v5634_v30, 16  ;;  %v5686_v33 = vld [vmem:[%s5535_s9 + $0x50] sm:$0xff]  }
  0x2c   : > { %v356_v46 = vshrl.u32 %v5621_v9, 16  ;;  %v1710_v47 = vsel %vm1666_vm4, %v1700_v19, %v1709_v37  ;;  %v347_v48 = vsel %vm303_vm2, %v342_v32, %v346_v38  ;;  %v350_v49 = vor.u32 %v348_v36, %v346_v38  ;;  %v5691_v38 = vld [vmem:[%s5535_s9 + $0x58] sm:$0xff]  }
  0x2d   : > { %4626 = vmatmul.mubr.msk.bf16.gmra.mrb[4].mxu1 %vm452_vm3, %v339_v22  ;;  %v354_v50 = vrot.slane %v352_v42, 1  ;;  %v1718_v52 = vor.u32 %v1717_v8, %v1714_v39  ;;  %v1723_v53 = vrot.slane %v1721_v44, 1  ;;  %v1726_v56 = vrot.slane %v1724_v45, 2 }
  0x2e   : > { %4629 = vmatprep.mubr.msk.bf16.mxu1 %vm452_vm3, %v347_v48  ;;  %v360_v57 = vshll.u32 %v5643_v43, 16  ;;  %v1730_v62 = vshrl.u32 %v5653_v51, 16  ;;  %v1733_v63 = vshll.u32 %v5653_v51, 16  ;;  %v364_v5 = vshrl.u32 %v5643_v43, 16 }
  0x2f   : > { %v355_v59 = vsel %vm303_vm2, %v350_v49, %v354_v50  ;;  %v358_v61 = vor.u32 %v356_v46, %v354_v50  ;;  %v1719_v0 = vsel %vm1666_vm4, %v1709_v37, %v1718_v52  ;;  %v1727_v2 = vor.u32 %v1726_v56, %v1723_v53  ;;  %v5696_v49 = vld [vmem:[%s5535_s9 + $0x58] sm:$0xff]  }
  0x30   : > { %v362_v3 = vrot.slane %v360_v57, 1  ;;  %4778 = vmatmul.mubr.msk.bf16.gmra.mrb[4].mxu0 %vm452_vm3, %v1710_v47  ;;  %v1732_v12 = vrot.slane %v1730_v62, 1  ;;  %v1735_v16 = vrot.slane %v1733_v63, 2  ;;  %v368_v10 = vshll.u32 %v5658_v58, 16 }
  0x31   : > { %v372_v17 = vshrl.u32 %v5658_v58, 16  ;;  %4781 = vmatprep.mubr.msk.bf16.mxu0 %vm452_vm3, %v1719_v0  ;;  %v1739_v20 = vshrl.u32 %v5666_v7, 16  ;;  %v1742_v27 = vshll.u32 %v5666_v7, 16  ;;  %v376_v28 = vshll.u32 %v5669_v11, 16 }
  0x32   : > { %v363_v19 = vsel %vm303_vm2, %v358_v61, %v362_v3  ;;  %v1736_v22 = vor.u32 %v1735_v16, %v1732_v12  ;;  %v370_v29 = vrot.slane %v368_v10, 1  ;;  %v1748_v31 = vshrl.u32 %v5678_v21, 16 }
  0x33   : > { %v1751_v32 = vshll.u32 %v5678_v21, 16  ;;  %v1728_v36 = vsel %vm1666_vm4, %v1718_v52, %v1727_v2  ;;  %v366_v37 = vor.u32 %v364_v5, %v362_v3  ;;  %v1741_v39 = vrot.slane %v1739_v20, 1  ;;  %v5710_v3 = vld [vmem:[%s5535_s9 + $0x60] sm:$0xff]   ;;  %v5715_v20 = vld [vmem:[%s5535_s9 + $0x68] sm:$0xff]  }
  0x34   : > { %v1744_v42 = vrot.slane %v1742_v27, 2  ;;  %v374_v8 = vor.u32 %v372_v17, %v370_v29  ;;  %v378_v44 = vrot.slane %v376_v28, 1  ;;  %v1737_v45 = vsel %vm1666_vm4, %v1727_v2, %v1736_v22  ;;  %v2107_v2 = vld [vmem:[%s5535_s9 + $0x8] sm:$0xc] }
  0x35   : > { %4630 = vmatmul.mubr.msk.bf16.gmra.mrb[8].mxu1 %vm452_vm3, %v355_v59  ;;  %v1750_v46 = vrot.slane %v1748_v31, 1  ;;  %v1753_v47 = vrot.slane %v1751_v32, 2  ;;  %v384_v48 = vshll.u32 %v5686_v33, 16  ;;  %v371_v50 = vsel %vm303_vm2, %v366_v37, %v370_v29 }
  0x36   : > { %4633 = vmatprep.mubr.msk.bf16.mxu1 %vm452_vm3, %v363_v19  ;;  %v380_v52 = vshrl.u32 %v5669_v11, 16  ;;  %v1757_v53 = vshrl.u32 %v5691_v38, 16  ;;  %v1760_v56 = vshll.u32 %v5691_v38, 16  ;;  %v1745_v57 = vor.u32 %v1744_v42, %v1741_v39 }
  0x37   : > { %v379_v59 = vsel %vm303_vm2, %v374_v8, %v378_v44  ;;  %v388_v61 = vshrl.u32 %v5686_v33, 16  ;;  %v392_v62 = vshll.u32 %v5696_v49, 16  ;;  %v1754_v63 = vor.u32 %v1753_v47, %v1750_v46 }
  0x38   : > { %4782 = vmatmul.mubr.msk.bf16.gmra.mrb[8].mxu0 %vm452_vm3, %v1728_v36  ;;  %v386_v0 = vrot.slane %v384_v48, 1  ;;  %v382_v5 = vor.u32 %v380_v52, %v378_v44  ;;  %v1759_v12 = vrot.slane %v1757_v53, 1  ;;  %v1762_v16 = vrot.slane %v1760_v56, 2  ;;  %v5732_v44 = vld [vmem:[%s5535_s9 + $0x70] sm:$0xff]  }
  0x39   : > { %4785 = vmatprep.mubr.msk.bf16.mxu0 %vm452_vm3, %v1737_v45  ;;  %v1746_v10 = vsel %vm1666_vm4, %v1736_v22, %v1745_v57  ;;  %v394_v19 = vrot.slane %v392_v62, 1  ;;  %v1755_v27 = vsel %vm1666_vm4, %v1745_v57, %v1754_v63  ;;  %v4168_v28 = vcombine.low %v2107_v2, %v5557_v18  ;;  %v5753_v2 = vld [vmem:[%s5535_s9 + $0x80] sm:$0xff]  }
  0x3a   : > { %v390_v17 = vor.u32 %v388_v61, %v386_v0  ;;  %v400_v29 = vshll.u32 %v5710_v3, 16  ;;  %v387_v31 = vsel %vm303_vm2, %v382_v5, %v386_v0  ;;  %v396_v32 = vshrl.u32 %v5696_v49, 16 }
  0x3b   : > { %v5724_v22 = vor.u32 %v1762_v16, %v1759_v12  ;;  %v404_v37 = vshrl.u32 %v5710_v3, 16  ;;  %v408_v39 = vshll.u32 %v5715_v20, 16  ;;  %v2114_v18 = vrot.slane %v4168_v28, 2 }
  0x3c   : > { %v395_v36 = vsel %vm303_vm2, %v390_v17, %v394_v19  ;;  %v2115_v42 = vrot.slane %v5564_v23, 2  ;;  %v402_v8 = vrot.slane %v400_v29, 1  ;;  %v398_v45 = vor.u32 %v396_v32, %v394_v19  ;;  %v5761_v17 = vld [vmem:[%s5535_s9 + $0x88] sm:$0xff]  }
  0x3d   : > { %4634 = vmatmul.mubr.msk.bf16.gmra.mrb[12].mxu1 %vm452_vm3, %v371_v50  ;;  %v1764_v46 = vsel %vm1666_vm4, %v1754_v63, %v5724_v22  ;;  %v410_v48 = vrot.slane %v408_v39, 1  ;;  %v5738_v50 = vld [vmem:[%s5535_s9 + $0x78] sm:$0xff]   ;;  %v416_v23 = vshll.u32 %v5732_v44, 16  ;;  %v2117_v56 = vrot.slane %v5581_v34, 2  ;;  %v4225_v34 = vld [vmem:[%s6458_s1 + $0xe] sm:$0x3] }
  0x3e   : > { %4637 = vmatprep.mubr.msk.bf16.mxu1 %vm452_vm3, %v379_v59  ;;  %v406_v47 = vor.u32 %v404_v37, %v402_v8  ;;  %v2116_v52 = vsel %vm2113_vm5, %v2114_v18, %v2115_v42  ;;  %v403_v53 = vsel %vm303_vm2, %v398_v45, %v402_v8  ;;  %v412_v57 = vshrl.u32 %v5715_v20, 16 }
  0x3f   : > { %v420_v61 = vshrl.u32 %v5732_v44, 16  ;;  %v424_v62 = vshll.u32 %v5738_v50, 16  ;;  %v2119_v63 = vrot.slane %v5590_v41, 2  ;;  %v418_v0 = vrot.slane %v416_v23, 1 }
  0x40   : > { %4786 = vmatmul.mubr.msk.bf16.gmra.mrb[12].mxu0 %vm452_vm3, %v1746_v10  ;;  %v411_v59 = vsel %vm303_vm2, %v406_v47, %v410_v48  ;;  %v414_v5 = vor.u32 %v412_v57, %v410_v48  ;;  %v2118_v12 = vsel %vm2113_vm5, %v2115_v42, %v2117_v56  ;;  %v5765_v19 = vand.u32 %v4225_v34, %v5511_v4  ;;  %v5782_v42 = vld [vmem:[%s5535_s9 + $0x90] ss:$0 sps:$4 sm:$0x11]   ;;  %v5809_v34 = vld [vmem:[%s5535_s9 + $0x60] sm:$0xff]  }
  0x41   : > { %4789 = vmatprep.mubr.msk.bf16.mxu0 %vm452_vm3, %v1755_v27  ;;  %v422_v16 = vor.u32 %v420_v61, %v418_v0  ;;  %v426_v10 = vrot.slane %v424_v62, 1  ;;  %v2120_v41 = vsel %vm2113_vm5, %v2117_v56, %v2119_v63  ;;  %v432_v27 = vshll.u32 %v5753_v2, 16 }
  0x42   : > { %v419_v28 = vsel %vm303_vm2, %v414_v5, %v418_v0  ;;  %v2121_v29 = vrot.slane %v5603_v55, 2  ;;  %v440_v37 = vshll.u32 %v5761_v17, 16  ;;  %v2123_v39 = vrot.slane %v5616_v1, 2  ;;  %v4109_v5 = vld [vmem:[%s6458_s1 + $0x6] sm:$0x3] }
  0x43   : > { %v427_v32 = vsel %vm303_vm2, %v422_v16, %v426_v10  ;;  %v434_v18 = vrot.slane %v432_v27, 1  ;;  %v444_v47 = vshrl.u32 %v5761_v17, 16  ;;  %v448_v48 = vshll.u32 %v5782_v42, 16  ;;  %v5828_v16 = vld [vmem:[%s5535_s9 + $0x68] sm:$0xff]  }
  0x44   : > { %v442_v45 = vrot.slane %v440_v37, 1 }
  0x45   : > { %4638 = vmatmul.mubr.msk.bf16.gmra.mrb[16].mxu1 %vm452_vm3, %v387_v31  ;;  %v428_v31 = vshrl.u32 %v5738_v50, 16  ;;  %v450_v57 = vrot.slane %v448_v48, 1 }
  0x46   : > { %4641 = vmatprep.mubr.msk.bf16.mxu1 %vm452_vm3, %v395_v36  ;;  %v436_v36 = vshrl.u32 %v5753_v2, 16  ;;  %v446_v56 = vor.u32 %v444_v47, %v442_v45  ;;  %v5881_v47 = vld [vmem:[%s5535_s9 + $0x98] ss:$0 sps:$4 sm:$0x33]  }
  0x47   : > { %v430_v55 = vor.u32 %v428_v31, %v426_v10  ;;  %v5833_v10 = vld [vmem:[%s5535_s9 + $0x70] sm:$0xff]   ;;  %v5849_v31 = vld [vmem:[%s5535_s9 + $0x80] sm:$0xff]  }
  0x48   : > { %4790 = vmatmul.mubr.msk.bf16.gmra.mrb[16].mxu0 %vm452_vm3, %v1764_v46  ;;  %v438_v8 = vor.u32 %v436_v36, %v434_v18  ;;  %v2124_v46 = vsel %vm2113_vm5, %v2121_v29, %v2123_v39  ;;  %v451_v62 = vsel %vm303_vm2, %v446_v56, %v450_v57  ;;  %v2139_v27 = vrot.slane %v5833_v10, 2 }
  0x49   : > { %4811 = vmatprep.mubr.msk.bf16.mxu0 %vm452_vm3, %v2116_v52  ;;  %v435_v1 = vsel %vm303_vm2, %v430_v55, %v434_v18  ;;  %v2125_v52 = vrot.slane %v5634_v30, 2  ;;  %v2129_v30 = vrot.slane %v5666_v7, 2  ;;  %v2133_v7 = vrot.slane %v5691_v38, 2  ;;  %v5865_v55 = vld [vmem:[%s5535_s9 + $0x90] sm:$0xff]  }
  0x4a   : > { %v443_v23 = vsel %vm303_vm2, %v438_v8, %v442_v45  ;;  %v2143_v36 = vrot.slane %v5849_v31, 2  ;;  %v2147_v8 = vrot.slane %v5865_v55, 2  ;;  %v2421_v45 = vld [vmem:[%s5535_s9 + $0x10] sm:$0xc] }
  0x4d   : > { %4642 = vmatmul.mubr.msk.bf16.gmra.mrb[20].mxu1 %vm452_vm3, %v403_v53  ;;  %v2127_v53 = vrot.slane %v5653_v51, 2  ;;  %v2131_v51 = vrot.slane %v5678_v21, 2  ;;  %v5818_v21 = vand.u32 %v4109_v5, %v5511_v4 }
  0x4e   : > { %4645 = vmatprep.mubr.msk.bf16.mxu1 %vm452_vm3, %v411_v59  ;;  %v2126_v59 = vsel %vm2113_vm5, %v2123_v39, %v2125_v52  ;;  %v5861_v39 = vld [vmem:[%s5535_s9 + $0x88] sm:$0xff]  }
  0x4f   : > { %v2128_v61 = vsel %vm2113_vm5, %v2125_v52, %v2127_v53  ;;  %v2132_v0 = vsel %vm2113_vm5, %v2129_v30, %v2131_v51 }
  0x50   : > { %4812 = vmatmul.mubr.msk.bf16.vlgmr.msra.gmra.mrb[0].mxu0 %vm452_vm3, %v2118_v12  ;;  %v2134_v12 = vsel %vm2113_vm5, %v2131_v51, %v2133_v7 }
  0x51   : > { %4848 = vmatpush3.bf16.msra.mxu0 %v5573_v26  ;;  %4815 = vmatprep.mubr.msk.bf16.mxu0 %vm452_vm3, %v2120_v41  ;;  %v2122_v26 = vsel %vm2113_vm5, %v2119_v63, %v2121_v29  ;;  %v2130_v63 = vsel %vm2113_vm5, %v2127_v53, %v2129_v30  ;;  %v2137_v41 = vrot.slane %v5828_v16, 2  ;;  %v2149_v53 = vrot.slane %v5881_v47, 2  ;;  %v5905_v30 = vld [vmem:[%s5535_s9 + $0x28] sm:$0xff]  }
  0x52   : > { %4885 = vmatprep.subr.bf16.mxu0 %v5765_v19 }
  0x53   : > { %v2140_v29 = vsel %vm2113_vm5, %v2137_v41, %v2139_v27 }
  0x55   : > { %4646 = vmatmul.mubr.msk.bf16.gmra.mrb[24].mxu1 %vm452_vm3, %v419_v28  ;;  %v5845_v28 = vld [vmem:[%s5535_s9 + $0x78] sm:$0xff]  }
  0x56   : > { %4649 = vmatprep.mubr.msk.bf16.mxu1 %vm452_vm3, %v427_v32  ;;  %v2141_v32 = vrot.slane %v5845_v28, 2 }
  0x58   : > { %4816 = vmatmul.mubr.msk.bf16.gmra.mrb[4].mxu0 %vm452_vm3, %v2122_v26  ;;  %v2142_v37 = vsel %vm2113_vm5, %v2139_v27, %v2141_v32  ;;  %v2144_v18 = vsel %vm2113_vm5, %v2141_v32, %v2143_v36  ;;  %v2145_v26 = vrot.slane %v5861_v39, 2  ;;  %v907_v32 = vld [vmem:[%s5535_s9] sm:$0xe] }
  0x59   : > { %4819 = vmatprep.mubr.msk.bf16.mxu0 %vm452_vm3, %v2124_v46  ;;  %v5875_v46 = vld [vmem:[%s5535_s9 + $0x14] sm:$0xf] }
  0x5a   : > { %v2148_v48 = vsel %vm2113_vm5, %v2145_v26, %v2147_v8  ;;  %v5885_v52 = vcombine.low %v2421_v45, %v5875_v46 }
  0x5c   : > { %v2553_v56 = vrot.slane %v5885_v52, 2 }
  0x5d   : > { %4650 = vmatmul.mubr.msk.bf16.gmra.mrb[28].mxu1 %vm452_vm3, %v435_v1  ;;  %v2146_v1 = vsel %vm2113_vm5, %v2143_v36, %v2145_v26 }
  0x5e   : > { %4653 = vmatprep.mubr.msk.bf16.mxu1 %vm452_vm3, %v443_v23  ;;  %v5888_v23 = vld [vmem:[%s5535_s9 + $0x18] sm:$0xff]  }
  0x5f   : > { %v2554_v57 = vrot.slane %v5888_v23, 2 }
  0x60   : > { %4820 = vmatmul.mubr.msk.bf16.gmra.mrb[8].mxu0 %vm452_vm3, %v2126_v59  ;;  %v2150_v59 = vsel %vm2113_vm5, %v2147_v8, %v2149_v53  ;;  %v5959_v8 = vld [vmem:[%s5535_s9 + $0x50] sm:$0xff]  }
  0x61   : > { %4823 = vmatprep.mubr.msk.bf16.mxu0 %vm452_vm3, %v2128_v61  ;;  %v5901_v61 = vld [vmem:[%s5535_s9 + $0x20] sm:$0xff]   ;;  %v2568_v53 = vrot.slane %v5959_v8, 2 }
  0x62   : > { %v2556_v51 = vrot.slane %v5901_v61, 2 }
  0x64   : > { %v2557_v5 = vsel %vm2113_vm5, %v2554_v57, %v2556_v51 }
  0x65   : > { %4654 = vmatmul.mubr.msk.bf16.gmra.mrb[32].mxu1 %vm452_vm3, %v451_v62  ;;  %v2555_v62 = vsel %vm2113_vm5, %v2553_v56, %v2554_v57 }
  0x66   : > { %4659 = vmatprep.mubr.msk.bf16.mxu1 %vm452_vm3, %v5547_v14  ;;  %v2135_v14 = vrot.slane %v5809_v34, 2 }
  0x68   : > { %4824 = vmatmul.mubr.msk.bf16.gmra.mrb[12].mxu0 %vm452_vm3, %v2130_v63  ;;  %v2136_v38 = vsel %vm2113_vm5, %v2133_v7, %v2135_v14  ;;  %v2558_v63 = vrot.slane %v5905_v30, 2  ;;  %v5920_v7 = vld [vmem:[%s5535_s9 + $0x30] sm:$0xff]  }
  0x69   : > { %4827 = vmatprep.mubr.msk.bf16.mxu0 %vm452_vm3, %v2132_v0  ;;  %v4245_v0 = vld [vmem:[%s6458_s1 + $0x10] sm:$0x3] }
  0x6d   : > { %4660 = vmatmul.mubr.msk.bf16.vlgmr.msra.gmra.mrb[0].mxu1 %vm452_vm3, %v5550_v15 }
  0x6e   : > { %4663 = vmatprep.mubr.msk.bf16.mxu1 %vm452_vm3, %v5567_v24  ;;  %4696 = vmatpush3.bf16.msra.mxu1 %v5584_v35  ;;  %v2138_v35 = vsel %vm2113_vm5, %v2135_v14, %v2137_v41  ;;  %v2559_v14 = vsel %vm2113_vm5, %v2556_v51, %v2558_v63  ;;  %v2560_v41 = vrot.slane %v5920_v7, 2  ;;  %v919_v51 = vrot.slane %v5587_v40, 1 }
  0x6f   : > { %4733 = vmatprep.subr.bf16.mxu1 %v5818_v21 }
  0x70   : > { %4828 = vmatmul.mubr.msk.bf16.gmra.mrb[16].mxu0 %vm452_vm3, %v2134_v12  ;;  %v5924_v12 = vld [vmem:[%s5535_s9 + $0x38] sm:$0xff]  }
  0x71   : > { %4831 = vmatprep.mubr.msk.bf16.mxu0 %vm452_vm3, %v2136_v38  ;;  %v5927_v38 = vand.u32 %v4245_v0, %v5511_v4  ;;  %v2562_v27 = vrot.slane %v5924_v12, 2  ;;  %v2561_v4 = vsel %vm2113_vm5, %v2558_v63, %v2560_v41  ;;  %v5982_v0 = vld [vmem:[%s5535_s9 + $0x68] sm:$0xff]  }
  0x75   : > { %4664 = vmatmul.mubr.msk.bf16.gmra.mrb[4].mxu1 %vm452_vm3, %v5587_v40  ;;  %v921_v40 = vrot.slane %v5600_v54, 1 }
  0x76   : > { %4667 = vmatprep.mubr.msk.bf16.mxu1 %vm452_vm3, %v5600_v54 }
  0x77   : > { %v922_v54 = vsel %vm913_vm6, %v919_v51, %v921_v40 }
  0x78   : > { %4832 = vmatmul.mubr.msk.bf16.gmra.mrb[20].mxu0 %vm452_vm3, %v2138_v35  ;;  %v5941_v35 = vld [vmem:[%s5535_s9 + $0x40] sm:$0xff]  }
  0x79   : > { %4835 = vmatprep.mubr.msk.bf16.mxu0 %vm452_vm3, %v2140_v29  ;;  %v5945_v29 = vld [vmem:[%s5535_s9 + $0x48] sm:$0xff]   ;;  %v2564_v36 = vrot.slane %v5941_v35, 2 }
  0x7b   : > { %v2565_v26 = vsel %vm2113_vm5, %v2562_v27, %v2564_v36 }
  0x7d   : > { %4668 = vmatmul.mubr.msk.bf16.gmra.mrb[8].mxu1 %vm452_vm3, %v5609_v60 }
  0x7e   : > { %4671 = vmatprep.mubr.msk.bf16.mxu1 %vm452_vm3, %v5621_v9 }
  0x80   : > { %4836 = vmatmul.mubr.msk.bf16.gmra.mrb[24].mxu0 %vm452_vm3, %v2142_v37  ;;  %v4090_v37 = vcombine.low %v907_v32, %v5542_v13  ;;  %v5964_v13 = vld [vmem:[%s5535_s9 + $0x58] sm:$0xff]  }
  0x81   : > { %4839 = vmatprep.mubr.msk.bf16.mxu0 %vm452_vm3, %v2144_v18  ;;  %v2566_v18 = vrot.slane %v5945_v29, 2  ;;  %v2570_v57 = vrot.slane %v5964_v13, 2 }
  0x82   : > { %v914_v45 = vrot.slane %v4090_v37, 1 }
  0x83   : > { %v2571_v63 = vsel %vm2113_vm5, %v2568_v53, %v2570_v57 }
  0x85   : > { %4672 = vmatmul.mubr.msk.bf16.gmra.mrb[12].mxu1 %vm452_vm3, %v5643_v43 }
  0x86   : > { %4675 = vmatprep.mubr.msk.bf16.mxu1 %vm452_vm3, %v5658_v58 }
  0x88   : > { %4840 = vmatmul.mubr.msk.bf16.gmra.mrb[28].mxu0 %vm452_vm3, %v2146_v1  ;;  %v915_v1 = vrot.slane %v5550_v15, 1  ;;  %v917_v15 = vrot.slane %v5567_v24, 1 }
  0x89   : > { %4843 = vmatprep.mubr.msk.bf16.mxu0 %vm452_vm3, %v2148_v48  ;;  %v2567_v48 = vsel %vm2113_vm5, %v2564_v36, %v2566_v18  ;;  %v6002_v36 = vld [vmem:[%s5535_s9 + $0x78] sm:$0xff]  }
  0x8a   : > { %v916_v56 = vsel %vm913_vm6, %v914_v45, %v915_v1  ;;  %v6015_v45 = vld [vmem:[%s5535_s9 + $0x80] sm:$0xff]  }
  0x8d   : > { %4676 = vmatmul.mubr.msk.bf16.gmra.mrb[16].mxu1 %vm452_vm3, %v5669_v11 }
  0x8e   : > { %4679 = vmatprep.mubr.msk.bf16.mxu1 %vm452_vm3, %v5686_v33 }
  0x90   : > { %4844 = vmatmul.mubr.msk.bf16.gmra.mrb[32].mxu0 %vm452_vm3, %v2150_v59  ;;  %v2569_v59 = vsel %vm2113_vm5, %v2566_v18, %v2568_v53  ;;  %v2578_v18 = vrot.slane %v6002_v36, 2  ;;  %v6020_v53 = vld [vmem:[%s5535_s9 + $0x88] sm:$0xff]  }
  0x91   : > { %4849 = vmatprep.mubr.msk.bf16.mxu0 %vm452_vm3, %v2555_v62  ;;  %v5977_v62 = vld [vmem:[%s5535_s9 + $0x60] sm:$0xff]  }
  0x92   : > { %v2572_v24 = vrot.slane %v5977_v62, 2 }
  0x95   : > { %4680 = vmatmul.mubr.msk.bf16.gmra.mrb[20].mxu1 %vm452_vm3, %v5696_v49 }
  0x96   : > { %4683 = vmatprep.mubr.msk.bf16.mxu1 %vm452_vm3, %v5710_v3 }
  0x98   : > { %4850 = vmatmul.mubr.msk.bf16.vlgmr.msra.gmra.mrb[0].mxu0 %vm452_vm3, %v2557_v5  ;;  %v918_v5 = vsel %vm913_vm6, %v915_v1, %v917_v15  ;;  %v927_v1 = vrot.slane %v5643_v43, 1  ;;  %v929_v43 = vrot.slane %v5658_v58, 1 }
  0x99   : > { %4886 = vmatpush3.bf16.msra.mxu0 %v5765_v19  ;;  %4853 = vmatprep.mubr.msk.bf16.mxu0 %vm452_vm3, %v2559_v14  ;;  %v2563_v19 = vsel %vm2113_vm5, %v2560_v41, %v2562_v27  ;;  %v920_v14 = vsel %vm913_vm6, %v917_v15, %v919_v51  ;;  %v2574_v41 = vrot.slane %v5982_v0, 2  ;;  %v2573_v27 = vsel %vm2113_vm5, %v2570_v57, %v2572_v24  ;;  %v6033_v51 = vld [vmem:[%s5535_s9 + $0x90] sm:$0xff]  }
  0x9a   : > { %4923 = vmatprep.subr.bf16.mxu0 %v5927_v38  ;;  %v2582_v15 = vrot.slane %v6020_v53, 2 }
  0x9b   : > { %v2575_v32 = vsel %vm2113_vm5, %v2572_v24, %v2574_v41 }
  0x9d   : > { %4684 = vmatmul.mubr.msk.bf16.gmra.mrb[24].mxu1 %vm452_vm3, %v5715_v20 }
  0x9e   : > { %4687 = vmatprep.mubr.msk.bf16.mxu1 %vm452_vm3, %v5732_v44 }
  0xa0   : > { %4854 = vmatmul.mubr.msk.bf16.gmra.mrb[4].mxu0 %vm452_vm3, %v2561_v4  ;;  %v5996_v4 = vld [vmem:[%s5535_s9 + $0x70] sm:$0xff]  }
  0xa1   : > { %4857 = vmatprep.mubr.msk.bf16.mxu0 %vm452_vm3, %v2563_v19  ;;  %v923_v19 = vrot.slane %v5609_v60, 1  ;;  %v925_v60 = vrot.slane %v5621_v9, 1  ;;  %v2580_v9 = vrot.slane %v6015_v45, 2 }
  0xa3   : > { %v924_v37 = vsel %vm913_vm6, %v921_v40, %v923_v19  ;;  %v928_v57 = vsel %vm913_vm6, %v925_v60, %v927_v1  ;;  %v2583_v24 = vsel %vm2113_vm5, %v2580_v9, %v2582_v15 }
  0xa5   : > { %4688 = vmatmul.mubr.msk.bf16.gmra.mrb[28].mxu1 %vm452_vm3, %v5738_v50 }
  0xa6   : > { %4691 = vmatprep.mubr.msk.bf16.mxu1 %vm452_vm3, %v5753_v2 }
  0xa8   : > { %4858 = vmatmul.mubr.msk.bf16.gmra.mrb[8].mxu0 %vm452_vm3, %v2565_v26 }
  0xa9   : > { %4861 = vmatprep.mubr.msk.bf16.mxu0 %vm452_vm3, %v2567_v48 }
  0xad   : > { %4692 = vmatmul.mubr.msk.bf16.gmra.mrb[32].mxu1 %vm452_vm3, %v5761_v17 }
  0xae   : > { %4697 = vmatprep.mubr.msk.bf16.mxu1 %vm452_vm3, %v916_v56  ;;  %v926_v56 = vsel %vm913_vm6, %v923_v19, %v925_v60  ;;  %v2876_v19 = vshrl.u32 %v5888_v23, 16  ;;  %v935_v60 = vrot.slane %v5696_v49, 1  ;;  %v2894_v49 = vshrl.u32 %v5905_v30, 16 }
  0xb0   : > { %4862 = vmatmul.mubr.msk.bf16.gmra.mrb[12].mxu0 %vm452_vm3, %v2569_v59  ;;  %v2581_v59 = vsel %vm2113_vm5, %v2578_v18, %v2580_v9 }
  0xb1   : > { %4865 = vmatprep.mubr.msk.bf16.mxu0 %vm452_vm3, %v2571_v63  ;;  %v931_v63 = vrot.slane %v5669_v11, 1  ;;  %v2871_v11 = vshll.u32 %v5885_v52, 16 }
  0xb3   : > { %v932_v58 = vsel %vm913_vm6, %v929_v43, %v931_v63 }
  0xb5   : > { %4698 = vmatmul.mubr.msk.bf16.vlgmr.msra.gmra.mrb[0].mxu1 %vm452_vm3, %v918_v5  ;;  %v6037_v5 = vld [vmem:[%s5535_s9 + $0x98] sm:$0xff]  }
  0xb6   : > { %4701 = vmatprep.mubr.msk.bf16.mxu1 %vm452_vm3, %v920_v14  ;;  %4734 = vmatpush3.bf16.msra.mxu1 %v5818_v21  ;;  %v2576_v21 = vrot.slane %v5996_v4, 2  ;;  %v930_v14 = vsel %vm913_vm6, %v927_v1, %v929_v43  ;;  %v2586_v40 = vrot.slane %v6037_v5, 2  ;;  %v2873_v1 = vrot.slane %v2871_v11, 3 }
  0xb7   : > { %4961 = vmatprep.subr.bf16.mxu1 %v5518_v6 }
  0xb8   : > { %4866 = vmatmul.mubr.msk.bf16.gmra.mrb[16].mxu0 %vm452_vm3, %v2573_v27  ;;  %v2577_v26 = vsel %vm2113_vm5, %v2574_v41, %v2576_v21  ;;  %v2579_v48 = vsel %vm2113_vm5, %v2576_v21, %v2578_v18  ;;  %v2584_v41 = vrot.slane %v6033_v51, 2  ;;  %v2868_v27 = vshrl.u32 %v5885_v52, 16  ;;  %v5354_v18 = vld [vmem:[%s5535_s9 + $0xa0] ss:$0 sps:$4 sm:$0x33]  }
  0xb9   : > { %4869 = vmatprep.mubr.msk.bf16.mxu0 %vm452_vm3, %v2575_v32  ;;  %v2879_v32 = vshll.u32 %v5888_v23, 16  ;;  %v2878_v52 = vrot.slane %v2876_v19, 2  ;;  %v2588_v9 = vrot.slane %v5354_v18, 2  ;;  %v2896_v19 = vrot.slane %v2894_v49, 2 }
  0xba   : > { %v2585_v21 = vsel %vm2113_vm5, %v2582_v15, %v2584_v41  ;;  %v2888_v15 = vshll.u32 %v5901_v61, 16  ;;  %v2924_v49 = vshll.u32 %v5941_v35, 16 }
  0xbd   : > { %4702 = vmatmul.mubr.msk.bf16.gmra.mrb[4].mxu1 %vm452_vm3, %v922_v54  ;;  %v933_v54 = vrot.slane %v5686_v33, 1 }
  0xbe   : > { %4705 = vmatprep.mubr.msk.bf16.mxu1 %vm452_vm3, %v924_v37  ;;  %v2587_v37 = vsel %vm2113_vm5, %v2584_v41, %v2586_v40 }
  0xbf   : > { %v936_v33 = vsel %vm913_vm6, %v933_v54, %v935_v60 }
  0xc0   : > { %4870 = vmatmul.mubr.msk.bf16.gmra.mrb[20].mxu0 %vm452_vm3, %v2577_v26  ;;  %v2870_v26 = vrot.slane %v2868_v27, 2  ;;  %v939_v27 = vrot.slane %v5715_v20, 1  ;;  %v2912_v20 = vshrl.u32 %v5924_v12, 16 }
  0xc1   : > { %4873 = vmatprep.mubr.msk.bf16.mxu0 %vm452_vm3, %v2579_v48  ;;  %v2881_v48 = vrot.slane %v2879_v32, 3 }
  0xc2   : > { %v2874_v43 = vor.u32 %v2873_v1, %v2870_v26  ;;  %v2915_v26 = vshll.u32 %v5924_v12, 16 }
  0xc5   : > { %4706 = vmatmul.mubr.msk.bf16.gmra.mrb[8].mxu1 %vm452_vm3, %v926_v56  ;;  %v934_v56 = vsel %vm913_vm6, %v931_v63, %v933_v54  ;;  %v937_v63 = vrot.slane %v5710_v3, 1  ;;  %v2903_v3 = vshrl.u32 %v5920_v7, 16 }
  0xc6   : > { %4709 = vmatprep.mubr.msk.bf16.mxu1 %vm452_vm3, %v928_v57  ;;  %v2885_v57 = vshrl.u32 %v5901_v61, 16 }
  0xc7   : > { %v938_v54 = vsel %vm913_vm6, %v935_v60, %v937_v63  ;;  %v941_v60 = vrot.slane %v5732_v44, 1 }
  0xc8   : > { %4874 = vmatmul.mubr.msk.bf16.gmra.mrb[24].mxu0 %vm452_vm3, %v2581_v59  ;;  %v2882_v59 = vor.u32 %v2881_v48, %v2878_v52  ;;  %v2887_v41 = vrot.slane %v2885_v57, 2  ;;  %v2905_v52 = vrot.slane %v2903_v3, 2  ;;  %v2917_v57 = vrot.slane %v2915_v26, 3 }
  0xc9   : > { %4877 = vmatprep.mubr.msk.bf16.mxu0 %vm452_vm3, %v2583_v24  ;;  %v2897_v24 = vshll.u32 %v5905_v30, 16  ;;  %v2942_v3 = vshll.u32 %v5959_v8, 16 }
  0xca   : > { %v2883_v11 = vsel %vm2866_vm7, %v2874_v43, %v2882_v59 }
  0xcb   : > { %v2899_v32 = vrot.slane %v2897_v24, 3  ;;  %v2930_v24 = vshrl.u32 %v5945_v29, 16 }
  0xcd   : > { %4710 = vmatmul.mubr.msk.bf16.gmra.mrb[12].mxu1 %vm452_vm3, %v930_v14  ;;  %v2589_v14 = vsel %vm2113_vm5, %v2586_v40, %v2588_v9  ;;  %v2906_v40 = vshll.u32 %v5920_v7, 16  ;;  %v2900_v18 = vor.u32 %v2899_v32, %v2896_v19  ;;  %v2932_v19 = vrot.slane %v2930_v24, 2  ;;  %v5359_v24 = vld [vmem:[%s5535_s9 + $0x18] sm:$0xff]  }
  0xce   : > { %4713 = vmatprep.mubr.msk.bf16.mxu1 %vm452_vm3, %v932_v58  ;;  %v2890_v58 = vrot.slane %v2888_v15, 3  ;;  %v942_v15 = vsel %vm913_vm6, %v939_v27, %v941_v60 }
  0xcf   : > { %v2908_v48 = vrot.slane %v2906_v40, 3 }
  0xd0   : > { %4878 = vmatmul.mubr.msk.bf16.gmra.mrb[28].mxu0 %vm452_vm3, %v2585_v21  ;;  %v2891_v21 = vor.u32 %v2890_v58, %v2887_v41  ;;  %v2926_v58 = vrot.slane %v2924_v49, 3  ;;  %v2966_v49 = vshrl.u32 %v5982_v0, 16 }
  0xd1   : > { %4881 = vmatprep.mubr.msk.bf16.mxu0 %vm452_vm3, %v2587_v37  ;;  %v940_v37 = vsel %vm913_vm6, %v937_v63, %v939_v27  ;;  %v2909_v43 = vor.u32 %v2908_v48, %v2905_v52  ;;  %v2933_v63 = vshll.u32 %v5945_v29, 16  ;;  %v947_v27 = vrot.slane %v5761_v17, 1  ;;  %v5358_v48 = vld [vmem:[%s5535_s9 + $0x10] sm:$0xff]  }
  0xd2   : > { %v2892_v1 = vsel %vm2866_vm7, %v2882_v59, %v2891_v21  ;;  %v2901_v9 = vsel %vm2866_vm7, %v2891_v21, %v2900_v18  ;;  %v2921_v59 = vshrl.u32 %v5941_v35, 16  ;;  %v2939_v21 = vshrl.u32 %v5959_v8, 16 }
  0xd3   : > { %v2935_v32 = vrot.slane %v2933_v63, 3  ;;  %v2948_v17 = vshrl.u32 %v5964_v13, 16  ;;  %v1353_v52 = vrot.slane %v5570_v25, 1  ;;  %v2960_v25 = vshll.u32 %v5977_v62, 16 }
  0xd4   : > { %v2923_v41 = vrot.slane %v2921_v59, 2  ;;  %v2941_v26 = vrot.slane %v2939_v21, 2  ;;  %v1356_v63 = vrot.slane %v5359_v24, 1 }
  0xd5   : > { %4714 = vmatmul.mubr.msk.bf16.gmra.mrb[16].mxu1 %vm452_vm3, %v934_v56  ;;  %v943_v56 = vrot.slane %v5738_v50, 1  ;;  %v2936_v40 = vor.u32 %v2935_v32, %v2932_v19  ;;  %v2968_v19 = vrot.slane %v2966_v49, 2  ;;  %v3005_v49 = vshll.u32 %v6020_v53, 16 }
  0xd6   : > { %4717 = vmatprep.mubr.msk.bf16.mxu1 %vm452_vm3, %v936_v33  ;;  %v2914_v33 = vrot.slane %v2912_v20, 2  ;;  %v949_v20 = vrot.slane %v5782_v42, 1 }
  0xd7   : > { %v944_v44 = vsel %vm913_vm6, %v941_v60, %v943_v56 }
  0xd8   : > { %4882 = vmatmul.mubr.msk.bf16.gmra.mrb[32].mxu0 %vm452_vm3, %v2589_v14  ;;  %v2918_v50 = vor.u32 %v2917_v57, %v2914_v33  ;;  %v2910_v14 = vsel %vm2866_vm7, %v2900_v18, %v2909_v43  ;;  %v2951_v18 = vshll.u32 %v5964_v13, 16  ;;  %v2950_v33 = vrot.slane %v2948_v17, 2 }
  0xd9   : > { %4887 = vmatprep.mubr.msk.bf16.mxu0 %vm452_vm3, %v2883_v11  ;;  %v2984_v17 = vshrl.u32 %v6002_v36, 16 }
  0xda   : > { %v2919_v11 = vsel %vm2866_vm7, %v2909_v43, %v2918_v50  ;;  %v2953_v57 = vrot.slane %v2951_v18, 3  ;;  %v2987_v18 = vshll.u32 %v6002_v36, 16 }
  0xdc   : > { %v2954_v59 = vor.u32 %v2953_v57, %v2950_v33  ;;  %v2986_v33 = vrot.slane %v2984_v17, 2  ;;  %v2989_v57 = vrot.slane %v2987_v18, 3  ;;  %v3023_v17 = vshll.u32 %v6037_v5, 16  ;;  %v5365_v18 = vld [vmem:[%s5535_s9 + $0x48] sm:$0xff]  }
  0xdd   : > { %4718 = vmatmul.mubr.msk.bf16.gmra.mrb[20].mxu1 %vm452_vm3, %v938_v54 }
  0xde   : > { %4721 = vmatprep.mubr.msk.bf16.mxu1 %vm452_vm3, %v940_v37 }
  0xe0   : > { %4888 = vmatmul.mubr.msk.bf16.vlgmr.msra.gmra.mrb[0].mxu0 %vm452_vm3, %v2892_v1  ;;  %v2944_v1 = vrot.slane %v2942_v3, 3  ;;  %v2978_v3 = vshll.u32 %v5996_v4, 16 }
  0xe1   : > { %4924 = vmatpush3.bf16.msra.mxu0 %v5927_v38  ;;  %4891 = vmatprep.mubr.msk.bf16.mxu0 %vm452_vm3, %v2901_v9  ;;  %v945_v38 = vrot.slane %v5753_v2, 1  ;;  %v2927_v2 = vor.u32 %v2926_v58, %v2923_v41  ;;  %v2962_v41 = vrot.slane %v2960_v25, 3  ;;  %v5360_v58 = vld [vmem:[%s5535_s9 + $0x20] sm:$0xff]   ;;  %v2990_v25 = vor.u32 %v2989_v57, %v2986_v33 }
  0xe2   : > { %v2945_v42 = vor.u32 %v2944_v1, %v2941_v26  ;;  %v3025_v57 = vrot.slane %v3023_v17, 3  ;;  %v3319_v17 = vrot.slane %v5905_v30, 3  ;;  %v3321_v30 = vrot.slane %v5920_v7, 3 }
  0xe3   : > { %v946_v54 = vsel %vm913_vm6, %v943_v56, %v945_v38  ;;  %v948_v37 = vsel %vm913_vm6, %v945_v38, %v947_v27  ;;  %v2928_v60 = vsel %vm2866_vm7, %v2918_v50, %v2927_v2  ;;  %v1354_v56 = vrot.slane %v5358_v48, 1  ;;  %v5362_v48 = vld [vmem:[%s5535_s9 + $0x30] sm:$0xff]  }
  0xe4   : > { %v2937_v9 = vsel %vm2866_vm7, %v2927_v2, %v2936_v40  ;;  %v2969_v50 = vshll.u32 %v5982_v0, 16  ;;  %v2946_v38 = vsel %vm2866_vm7, %v2936_v40, %v2945_v42 }
  0xe5   : > { %4722 = vmatmul.mubr.msk.bf16.gmra.mrb[24].mxu1 %vm452_vm3, %v942_v15  ;;  %v950_v15 = vsel %vm913_vm6, %v947_v27, %v949_v20  ;;  %v1355_v43 = vsel %vm913_vm6, %v1353_v52, %v1354_v56  ;;  %v1358_v27 = vrot.slane %v5360_v58, 1  ;;  %v5361_v20 = vld [vmem:[%s5535_s9 + $0x28] sm:$0xff]   ;;  %v2980_v52 = vrot.slane %v2978_v3, 3 }
  0xe6   : > { %4725 = vmatprep.mubr.msk.bf16.mxu1 %vm452_vm3, %v944_v44  ;;  %v2957_v44 = vshrl.u32 %v5977_v62, 16  ;;  %v2971_v32 = vrot.slane %v2969_v50, 3  ;;  %v1360_v26 = vrot.slane %v5361_v20, 1  ;;  %v5363_v50 = vld [vmem:[%s5535_s9 + $0x38] sm:$0xff]   ;;  %v1368_v20 = vrot.slane %v5365_v18, 1 }
  0xe7   : > { %v1359_v2 = vsel %vm913_vm6, %v1356_v63, %v1358_v27  ;;  %v1364_v24 = vrot.slane %v5363_v50, 1  ;;  %v1380_v18 = vrot.slane %v5845_v28, 1 }
  0xe8   : > { %4892 = vmatmul.mubr.msk.bf16.gmra.mrb[4].mxu0 %vm452_vm3, %v2910_v14  ;;  %v2959_v14 = vrot.slane %v2957_v44, 2  ;;  %v2972_v40 = vor.u32 %v2971_v32, %v2968_v19  ;;  %v2996_v44 = vshll.u32 %v6015_v45, 16  ;;  %v3007_v19 = vrot.slane %v3005_v49, 3  ;;  %v5367_v49 = vld [vmem:[%s5535_s9 + $0x58] sm:$0xff]  }
  0xe9   : > { %4895 = vmatprep.mubr.msk.bf16.mxu0 %vm452_vm3, %v2919_v11  ;;  %v2955_v11 = vsel %vm2866_vm7, %v2945_v42, %v2954_v59  ;;  %v1372_v50 = vrot.slane %v5367_v49, 1  ;;  %v1775_v49 = vshrl.u32 %v5828_v16, 16 }
  0xea   : > { %v2963_v21 = vor.u32 %v2962_v41, %v2959_v14  ;;  %v2998_v14 = vrot.slane %v2996_v44, 3  ;;  %v5364_v41 = vld [vmem:[%s5535_s9 + $0x40] sm:$0xff]  }
  0xeb   : > { %v1366_v58 = vrot.slane %v5364_v41, 1 }
  0xed   : > { %4726 = vmatmul.mubr.msk.bf16.gmra.mrb[28].mxu1 %vm452_vm3, %v946_v54  ;;  %v1357_v54 = vsel %vm913_vm6, %v1354_v56, %v1356_v63  ;;  %v1362_v56 = vrot.slane %v5362_v48, 1 }
  0xee   : > { %4729 = vmatprep.mubr.msk.bf16.mxu1 %vm452_vm3, %v948_v37  ;;  %v2975_v37 = vshrl.u32 %v5996_v4, 16 }
  0xef   : > { %v1365_v32 = vsel %vm913_vm6, %v1362_v56, %v1364_v24 }
  0xf0   : > { %4896 = vmatmul.mubr.msk.bf16.gmra.mrb[8].mxu0 %vm452_vm3, %v2928_v60  ;;  %v2964_v60 = vsel %vm2866_vm7, %v2954_v59, %v2963_v21  ;;  %v2977_v1 = vrot.slane %v2975_v37, 2  ;;  %v3002_v59 = vshrl.u32 %v6020_v53, 16  ;;  %v3014_v37 = vshll.u32 %v6033_v51, 16 }
  0xf1   : > { %4899 = vmatprep.mubr.msk.bf16.mxu0 %vm452_vm3, %v2937_v9  ;;  %v2973_v9 = vsel %vm2866_vm7, %v2963_v21, %v2972_v40  ;;  %v1367_v21 = vsel %vm913_vm6, %v1364_v24, %v1366_v58 }
  0xf2   : > { %v2981_v42 = vor.u32 %v2980_v52, %v2977_v1  ;;  %v3016_v1 = vrot.slane %v3014_v37, 3  ;;  %v5366_v52 = vld [vmem:[%s5535_s9 + $0x50] sm:$0xff]  }
  0xf3   : > { %v1370_v48 = vrot.slane %v5366_v52, 1  ;;  %v3323_v52 = vrot.slane %v5924_v12, 3 }
  0xf4   : > { %v2982_v63 = vsel %vm2866_vm7, %v2972_v40, %v2981_v42  ;;  %v3020_v40 = vshrl.u32 %v6037_v5, 16 }
  0xf5   : > { %4730 = vmatmul.mubr.msk.bf16.gmra.mrb[32].mxu1 %vm452_vm3, %v950_v15  ;;  %v1361_v15 = vsel %vm913_vm6, %v1358_v27, %v1360_v26  ;;  %v2991_v27 = vsel %vm2866_vm7, %v2981_v42, %v2990_v25  ;;  %v3324_v7 = vsel %vm3313_vm8, %v3321_v30, %v3323_v52 }
  0xf6   : > { %4735 = vmatprep.mubr.msk.bf16.mxu1 %vm452_vm3, %v1355_v43  ;;  %v2993_v43 = vshrl.u32 %v6015_v45, 16  ;;  %v3022_v33 = vrot.slane %v3020_v40, 2 }
  0xf8   : > { %4900 = vmatmul.mubr.msk.bf16.gmra.mrb[12].mxu0 %vm452_vm3, %v2946_v38  ;;  %v2995_v38 = vrot.slane %v2993_v43, 2 }
  0xf9   : > { %4903 = vmatprep.mubr.msk.bf16.mxu0 %vm452_vm3, %v2955_v11  ;;  %v3004_v11 = vrot.slane %v3002_v59, 2  ;;  %v3307_v59 = vld [vmem:[%s5535_s9 + $0x10] sm:$0x8] }
  0xfb   : > { %v3008_v3 = vor.u32 %v3007_v19, %v3004_v11 }
  0xfd   : > { %4736 = vmatmul.mubr.msk.bf16.vlgmr.msra.gmra.mrb[0].mxu1 %vm452_vm3, %v1357_v54  ;;  %v2999_v54 = vor.u32 %v2998_v14, %v2995_v38  ;;  %v1374_v14 = vrot.slane %v5809_v34, 1 }
  0xfe   : > { %4739 = vmatprep.mubr.msk.bf16.mxu1 %vm452_vm3, %v1359_v2  ;;  %4962 = vmatpush3.bf16.msra.mxu1 %v5518_v6  ;;  %v1363_v6 = vsel %vm913_vm6, %v1360_v26, %v1362_v56  ;;  %v3011_v2 = vshrl.u32 %v6033_v51, 16  ;;  %v6172_v56 = vld [vmem:[%s5535_s9 + $0xa0] ss:$0 sps:$4 sm:$0x77]  }
  0xff   : > { %v3000_v26 = vsel %vm2866_vm7, %v2990_v25, %v2999_v54  ;;  %v3029_v43 = vshrl.u32 %v6172_v56, 16  ;;  %v3032_v44 = vshll.u32 %v6172_v56, 16  ;;  %v3026_v25 = vor.u32 %v3025_v57, %v3022_v33 }
 0x100   : > { %4904 = vmatmul.mubr.msk.bf16.gmra.mrb[16].mxu0 %vm452_vm3, %v2964_v60  ;;  %v3013_v60 = vrot.slane %v3011_v2, 2  ;;  %v1375_v19 = vsel %vm913_vm6, %v1372_v50, %v1374_v14  ;;  %v1378_v2 = vrot.slane %v5833_v10, 1  ;;  %v1386_v33 = vrot.slane %v5865_v55, 1 }
 0x101   : > { %4907 = vmatprep.mubr.msk.bf16.mxu0 %vm452_vm3, %v2973_v9  ;;  %v3009_v9 = vsel %vm2866_vm7, %v2999_v54, %v3008_v3  ;;  %v3034_v38 = vrot.slane %v3032_v44, 3  ;;  %v3315_v54 = vrot.slane %v5888_v23, 3  ;;  %v3317_v23 = vrot.slane %v5901_v61, 3 }
 0x102   : > { %v3017_v42 = vor.u32 %v3016_v1, %v3013_v60  ;;  %v1381_v61 = vsel %vm913_vm6, %v1378_v2, %v1380_v18  ;;  %v1766_v57 = vshrl.u32 %v5809_v34, 16 }
 0x103   : > { %v3320_v60 = vsel %vm3313_vm8, %v3317_v23, %v3319_v17 }
 0x104   : > { %v3018_v24 = vsel %vm2866_vm7, %v3008_v3, %v3017_v42  ;;  %v3027_v41 = vsel %vm2866_vm7, %v3017_v42, %v3026_v25  ;;  %v5357_v42 = vld [vmem:[%s5535_s9 + $0x98] ss:$0 sps:$4 sm:$0x11]   ;;  %v1768_v44 = vrot.slane %v1766_v57, 1 }
 0x105   : > { %4740 = vmatmul.mubr.msk.bf16.gmra.mrb[4].mxu1 %vm452_vm3, %v1361_v15  ;;  %v1369_v15 = vsel %vm913_vm6, %v1366_v58, %v1368_v20  ;;  %v4246_v58 = vcombine.low %v3307_v59, %v5875_v46  ;;  %v3327_v59 = vrot.slane %v5945_v29, 3 }
 0x106   : > { %4743 = vmatprep.mubr.msk.bf16.mxu1 %vm452_vm3, %v1363_v6  ;;  %v1371_v6 = vsel %vm913_vm6, %v1368_v20, %v1370_v48  ;;  %v3318_v20 = vsel %vm3313_vm8, %v3315_v54, %v3317_v23 }
 0x108   : > { %4908 = vmatmul.mubr.msk.bf16.gmra.mrb[20].mxu0 %vm452_vm3, %v2982_v63  ;;  %v3031_v63 = vrot.slane %v3029_v43, 2 }
 0x109   : > { %4911 = vmatprep.mubr.msk.bf16.mxu0 %vm452_vm3, %v2991_v27  ;;  %v1373_v27 = vsel %vm913_vm6, %v1370_v48, %v1372_v50  ;;  %v1384_v48 = vrot.slane %v5861_v39, 1  ;;  %v1778_v50 = vshll.u32 %v5828_v16, 16 }
 0x10a   : > { %v3035_v11 = vor.u32 %v3034_v38, %v3031_v63  ;;  %v1787_v38 = vshll.u32 %v5833_v10, 16 }
 0x10b   : > { %v1387_v43 = vsel %vm913_vm6, %v1384_v48, %v1386_v33 }
 0x10c   : > { %v3036_v46 = vsel %vm2866_vm7, %v3026_v25, %v3035_v11 }
 0x10d   : > { %4744 = vmatmul.mubr.msk.bf16.gmra.mrb[8].mxu1 %vm452_vm3, %v1365_v32  ;;  %v3314_v32 = vrot.slane %v4246_v58, 3  ;;  %v1780_v58 = vrot.slane %v1778_v50, 2 }
 0x10e   : > { %4747 = vmatprep.mubr.msk.bf16.mxu1 %vm452_vm3, %v1367_v21  ;;  %v1376_v21 = vrot.slane %v5828_v16, 1 }
 0x10f   : > { %v3316_v37 = vsel %vm3313_vm8, %v3314_v32, %v3315_v54  ;;  %v3331_v32 = vrot.slane %v5964_v13, 3  ;;  %v1793_v54 = vshrl.u32 %v5845_v28, 16 }
 0x110   : > { %4912 = vmatmul.mubr.msk.bf16.gmra.mrb[24].mxu0 %vm452_vm3, %v3000_v26  ;;  %v1377_v3 = vsel %vm913_vm6, %v1374_v14, %v1376_v21  ;;  %v1379_v40 = vsel %vm913_vm6, %v1376_v21, %v1378_v2  ;;  %v1382_v26 = vrot.slane %v5849_v31, 1  ;;  %v1796_v21 = vshll.u32 %v5845_v28, 16 }
 0x111   : > { %4915 = vmatprep.mubr.msk.bf16.mxu0 %vm452_vm3, %v3009_v9  ;;  %v3322_v9 = vsel %vm3313_vm8, %v3319_v17, %v3321_v30 }
 0x112   : > { %v1383_v1 = vsel %vm913_vm6, %v1380_v18, %v1382_v26  ;;  %v1385_v12 = vsel %vm913_vm6, %v1382_v26, %v1384_v48  ;;  %v1798_v23 = vrot.slane %v1796_v21, 2  ;;  %v1811_v26 = vshrl.u32 %v5861_v39, 16 }
 0x114   : > { %v1813_v48 = vrot.slane %v1811_v26, 1 }
 0x115   : > { %4748 = vmatmul.mubr.msk.bf16.gmra.mrb[12].mxu1 %vm452_vm3, %v1369_v15  ;;  %v1769_v15 = vshll.u32 %v5809_v34, 16  ;;  %v1388_v34 = vrot.slane %v5357_v42, 1  ;;  %v1832_v42 = vshll.u32 %v5881_v47, 16 }
 0x116   : > { %4751 = vmatprep.mubr.msk.bf16.mxu1 %vm452_vm3, %v1371_v6  ;;  %v3325_v6 = vrot.slane %v5941_v35, 3  ;;  %v1784_v35 = vshrl.u32 %v5833_v10, 16 }
 0x117   : > { %v1771_v25 = vrot.slane %v1769_v15, 2  ;;  %v1389_v29 = vsel %vm913_vm6, %v1386_v33, %v1388_v34  ;;  %v3337_v33 = vrot.slane %v5996_v4, 3 }
 0x118   : > { %4916 = vmatmul.mubr.msk.bf16.gmra.mrb[28].mxu0 %vm452_vm3, %v3018_v24  ;;  %v3326_v24 = vsel %vm3313_vm8, %v3323_v52, %v3325_v6  ;;  %v3328_v14 = vsel %vm3313_vm8, %v3325_v6, %v3327_v59  ;;  %v1786_v11 = vrot.slane %v1784_v35, 1  ;;  %v3347_v35 = vrot.slane %v6037_v5, 3 }
 0x119   : > { %4919 = vmatprep.mubr.msk.bf16.mxu0 %vm452_vm3, %v3027_v41  ;;  %v1772_v63 = vor.u32 %v1771_v25, %v1768_v44  ;;  %v1777_v41 = vrot.slane %v1775_v49, 1  ;;  %v3343_v49 = vrot.slane %v6020_v53, 3 }
 0x11b   : > { %v1773_v16 = vsel %vm1666_vm4, %v5724_v22, %v1772_v63  ;;  %v1781_v10 = vor.u32 %v1780_v58, %v1777_v41  ;;  %v1805_v22 = vshll.u32 %v5849_v31, 16 }
 0x11d   : > { %4752 = vmatmul.mubr.msk.bf16.gmra.mrb[16].mxu1 %vm452_vm3, %v1373_v27  ;;  %v3329_v27 = vrot.slane %v5959_v8, 3  ;;  %v1802_v8 = vshrl.u32 %v5849_v31, 16  ;;  %v1782_v13 = vsel %vm1666_vm4, %v1772_v63, %v1781_v10  ;;  %v1807_v18 = vrot.slane %v1805_v22, 2 }
 0x11e   : > { %4755 = vmatprep.mubr.msk.bf16.mxu1 %vm452_vm3, %v1375_v19  ;;  %v1789_v19 = vrot.slane %v1787_v38, 2 }
 0x11f   : > { %v1804_v17 = vrot.slane %v1802_v8, 1 }
 0x120   : > { %4920 = vmatmul.mubr.msk.bf16.gmra.mrb[32].mxu0 %vm452_vm3, %v3036_v46  ;;  %v3330_v46 = vsel %vm3313_vm8, %v3327_v59, %v3329_v27  ;;  %v1790_v2 = vor.u32 %v1789_v19, %v1786_v11  ;;  %v3341_v59 = vrot.slane %v6015_v45, 3  ;;  %v3345_v45 = vrot.slane %v6033_v51, 3 }
 0x121   : > { %4925 = vmatprep.mubr.msk.bf16.mxu0 %vm452_vm3, %v3316_v37  ;;  %v3332_v37 = vsel %vm3313_vm8, %v3329_v27, %v3331_v32  ;;  %v1808_v30 = vor.u32 %v1807_v18, %v1804_v17 }
 0x122   : > { %v1791_v28 = vsel %vm1666_vm4, %v1781_v10, %v1790_v2  ;;  %v3346_v53 = vsel %vm3313_vm8, %v3343_v49, %v3345_v45  ;;  %v3348_v38 = vsel %vm3313_vm8, %v3345_v45, %v3347_v35 }
 0x125   : > { %4756 = vmatmul.mubr.msk.bf16.gmra.mrb[20].mxu1 %vm452_vm3, %v1377_v3  ;;  %v1795_v3 = vrot.slane %v1793_v54, 1 }
 0x126   : > { %4759 = vmatprep.mubr.msk.bf16.mxu1 %vm452_vm3, %v1379_v40  ;;  %v3333_v40 = vrot.slane %v5977_v62, 3  ;;  %v1820_v62 = vshrl.u32 %v5865_v55, 16 }
 0x127   : > { %v1799_v31 = vor.u32 %v1798_v23, %v1795_v3 }
 0x128   : > { %4926 = vmatmul.mubr.msk.bf16.vlgmr.msra.gmra.mrb[0].mxu0 %vm452_vm3, %v3318_v20  ;;  %v3335_v20 = vrot.slane %v5982_v0, 3  ;;  %v1822_v57 = vrot.slane %v1820_v62, 1 }
 0x129   : > { %4929 = vmatprep.mubr.msk.bf16.mxu0 %vm452_vm3, %v3320_v60  ;;  %v1814_v60 = vshll.u32 %v5861_v39, 16  ;;  %v1800_v0 = vsel %vm1666_vm4, %v1790_v2, %v1799_v31  ;;  %v1809_v39 = vsel %vm1666_vm4, %v1799_v31, %v1808_v30 }
 0x12a   : > { %v3336_v52 = vsel %vm3313_vm8, %v3333_v40, %v3335_v20  ;;  %v3338_v6 = vsel %vm3313_vm8, %v3335_v20, %v3337_v33 }
 0x12d   : > { %4760 = vmatmul.mubr.msk.bf16.gmra.mrb[24].mxu1 %vm452_vm3, %v1381_v61  ;;  %v3334_v61 = vsel %vm3313_vm8, %v3331_v32, %v3333_v40  ;;  %v6332_v40 = vld [vmem:[%s6459_s2] ss:$0 sm:$0xff] }
 0x12e   : > { %4763 = vmatprep.mubr.msk.bf16.mxu1 %vm452_vm3, %v1383_v1  ;;  %v1823_v1 = vshll.u32 %v5865_v55, 16 }
 0x130   : > { %4930 = vmatmul.mubr.msk.bf16.gmra.mrb[4].mxu0 %vm452_vm3, %v3322_v9  ;;  %v1816_v9 = vrot.slane %v1814_v60, 2  ;;  %v1825_v15 = vrot.slane %v1823_v1, 2 }
 0x131   : > { %4933 = vmatprep.mubr.msk.bf16.mxu0 %vm452_vm3, %v3324_v7  ;;  %v3339_v7 = vrot.slane %v6002_v36, 3  ;;  %v1834_v36 = vrot.slane %v1832_v42, 2 }
 0x132   : > { %v1817_v55 = vor.u32 %v1816_v9, %v1813_v48 }
 0x133   : > { %v3340_v4 = vsel %vm3313_vm8, %v3337_v33, %v3339_v7  ;;  %v3342_v50 = vsel %vm3313_vm8, %v3339_v7, %v3341_v59 }
 0x134   : > { %v1818_v44 = vsel %vm1666_vm4, %v1808_v30, %v1817_v55 }
 0x135   : > { %4764 = vmatmul.mubr.msk.bf16.gmra.mrb[28].mxu1 %vm452_vm3, %v1385_v12  ;;  %v1829_v12 = vshrl.u32 %v5881_v47, 16 }
 0x136   : > { %4767 = vmatprep.mubr.msk.bf16.mxu1 %vm452_vm3, %v1387_v43  ;;  %v1826_v43 = vor.u32 %v1825_v15, %v1822_v57 }
 0x137   : > { %v1831_v25 = vrot.slane %v1829_v12, 1 }
 0x138   : > { %4934 = vmatmul.mubr.msk.bf16.gmra.mrb[8].mxu0 %vm452_vm3, %v3326_v24  ;;  %v1827_v34 = vsel %vm1666_vm4, %v1817_v55, %v1826_v43  ;;  %v3344_v24 = vsel %vm3313_vm8, %v3341_v59, %v3343_v49 }
 0x139   : > { %4937 = vmatprep.mubr.msk.bf16.mxu0 %vm452_vm3, %v3328_v14  ;;  %v1835_v47 = vor.u32 %v1834_v36, %v1831_v25  ;;  %v3349_v14 = vrot.slane %v6172_v56, 3 }
 0x13b   : > { %v1836_v63 = vsel %vm1666_vm4, %v1826_v43, %v1835_v47 }
 0x13d   : > { %4768 = vmatmul.mubr.msk.bf16.gmra.mrb[32].mxu1 %vm452_vm3, %v1389_v29  ;;  %v3350_v29 = vsel %vm3313_vm8, %v3347_v35, %v3349_v14 }
 0x13e   : > { %4793 = vmatprep.mubr.msk.bf16.mxu1 %vm452_vm3, %v1773_v16 }
 0x140   : > { %4938 = vmatmul.mubr.msk.bf16.gmra.mrb[12].mxu0 %vm452_vm3, %v3330_v46 }
 0x141   : > { %4941 = vmatprep.mubr.msk.bf16.mxu0 %vm452_vm3, %v3332_v37 }
 0x145   : > { %4794 = vmatmul.mubr.msk.bf16.vlgmr.msra.gmra.mrb[20].mxu1 %vm452_vm3, %v1782_v13 }
 0x146   : > { %4797 = vmatprep.mubr.msk.bf16.mxu1 %vm452_vm3, %v1791_v28 }
 0x148   : > { %4942 = vmatmul.mubr.msk.bf16.gmra.mrb[16].mxu0 %vm452_vm3, %v3334_v61 }
 0x149   : > { %4945 = vmatprep.mubr.msk.bf16.mxu0 %vm452_vm3, %v3336_v52 }
 0x14d   : > { %4798 = vmatmul.mubr.msk.bf16.gmra.mrb[24].mxu1 %vm452_vm3, %v1800_v0 }
 0x14e   : > { %4801 = vmatprep.mubr.msk.bf16.mxu1 %vm452_vm3, %v1809_v39 }
 0x150   : > { %4946 = vmatmul.mubr.msk.bf16.gmra.mrb[20].mxu0 %vm452_vm3, %v3338_v6 }
 0x151   : > { %4949 = vmatprep.mubr.msk.bf16.mxu0 %vm452_vm3, %v3340_v4 }
 0x155   : > { %4802 = vmatmul.mubr.msk.bf16.gmra.mrb[28].mxu1 %vm452_vm3, %v1818_v44 }
 0x156   : > { %4805 = vmatprep.mubr.msk.bf16.mxu1 %vm452_vm3, %v1827_v34 }
 0x158   : > { %4950 = vmatmul.mubr.msk.bf16.gmra.mrb[24].mxu0 %vm452_vm3, %v3342_v50 }
 0x159   : > { %4953 = vmatprep.mubr.msk.bf16.mxu0 %vm452_vm3, %v3344_v24 }
 0x15d   : > { %4806 = vmatmul.mubr.msk.bf16.gmra.mrb[32].mxu1 %vm452_vm3, %v1836_v63 }
 0x160   : > { %4954 = vmatmul.mubr.msk.bf16.gmra.mrb[28].mxu0 %vm452_vm3, %v3346_v53 }
 0x161   : > { %4957 = vmatprep.mubr.msk.bf16.mxu0 %vm452_vm3, %v3348_v38 }
 0x168   : > { %4958 = vmatmul.mubr.msk.bf16.gmra.mrb[32].mxu0 %vm452_vm3, %v3350_v29 }
 0x1d0   : > { %v4737_v41 = vpop.f32.mrb[0].mxu1 }
 0x1d1   : > { %v1481_v51 = vpop.f32.mrb[1].mxu1 }
 0x1d2   : > { %v4738_v58 = vpop.f32.mrb[2].mxu1 }
 0x1d3   : > { %v1484_v5 = vpop.f32.mrb[3].mxu1 }
 0x1d8   : > { %v4741_v27 = vpop.f32.mrb[4].mxu1 }
 0x1d9   : > { %v1497_v16 = vpop.f32.mrb[5].mxu1 }
 0x1da   : > { %v4742_v11 = vpop.f32.mrb[6].mxu1 }
 0x1db   : > { %v1500_v19 = vpop.f32.mrb[7].mxu1 }
 0x1e0   : > { %v6305_v32 = vpop.f32.mrb[8].mxu1 }
 0x1e1   : > { %v6307_v10 = vpop.f32.mrb[9].mxu1 }
 0x1e2   : > { %v6309_v54 = vpop.f32.mrb[10].mxu1 }
 0x1e3   : > { %v6311_v56 = vpop.f32.mrb[11].mxu1 }
 0x1e8   : > { %v6313_v21 = vpop.f32.mrb[12].mxu1 }
 0x1e9   : > { %v6315_v46 = vpop.f32.mrb[13].mxu1 }
 0x1ea   : > { %v6317_v2 = vpop.f32.mrb[14].mxu1 }
 0x1eb   : > { %v6319_v8 = vpop.f32.mrb[15].mxu1 }
 0x1f0   : > { %v6321_v22 = vpop.f32.mrb[16].mxu1 }
 0x1f1   : > { %v6323_v37 = vpop.f32.mrb[17].mxu1 }
 0x1f2   : > { %v6325_v13 = vpop.f32.mrb[18].mxu1 }
 0x1f3   : > { %v6327_v3 = vpop.f32.mrb[19].mxu1 }
 0x1fb   : > { %v4927_v23 = vpop.f32.mrb[0].mxu0 }
 0x1fc   : > { %v4963_v28 = vadd.f32 %v4927_v23, %v4737_v41  ;;  %v3442_v17 = vpop.f32.mrb[1].mxu0 }
 0x1fd   : > { %v4964_v18 = vadd.f32 %v3442_v17, %v1481_v51  ;;  %v4928_v20 = vpop.f32.mrb[2].mxu0 }
 0x1fe   : > { %v3630_v31 = vadd.f32 %v4963_v28, %v6332_v40  ;;  %v4965_v26 = vadd.f32 %v4928_v20, %v4738_v58  ;;  %v3445_v60 = vpop.f32.mrb[3].mxu0 }
 0x1ff   : > { %v3628_v61 = vadd.f32 %v4964_v18, %v6332_v40  ;;  %v4966_v30 = vadd.f32 %v3445_v60, %v1484_v5 }
 0x200   : > { %v3702_v62 = vmul.f32 0.1, %v3630_v31  ;;  %v3631_v1 = vadd.f32 %v4965_v26, %v6332_v40  ;;  %vm3666_vm9 = vcmp.gt.f32.partialorder %v3630_v31, 0.0 }
 0x201   : > { %v3700_v52 = vmul.f32 0.1, %v3628_v61  ;;  %v3629_v0 = vadd.f32 %v4966_v30, %v6332_v40  ;;  %vm3664_vm10 = vcmp.gt.f32.partialorder %v3628_v61, 0.0 }
 0x202   : > { %vm3667_vm11 = vcmp.gt.f32.partialorder %v3631_v1, 0.0  ;;  %v3703_v48 = vmul.f32 0.1, %v3631_v1  ;;  %v3738_v39 = vsel %vm3666_vm9, %v3630_v31, %v3702_v62 }
 0x203   : > { %vm3665_vm12 = vcmp.gt.f32.partialorder %v3629_v0, 0.0  ;;  %v3701_v9 = vmul.f32 0.1, %v3629_v0  ;;  %v4931_v33 = vpop.f32.mrb[4].mxu0  ;;  %v3736_v55 = vsel %vm3664_vm10, %v3628_v61, %v3700_v52 }
 0x204   : > { %v3739_v57 = vsel %vm3667_vm11, %v3631_v1, %v3703_v48  ;;  %v4967_v15 = vadd.f32 %v4931_v33, %v4741_v27  ;;  %v3458_v7 = vpop.f32.mrb[5].mxu0 }
 0x205   : > { %v4349_v12 = vpack.c.bf16 %v3739_v57, %v3738_v39  ;;  %v3737_v42 = vsel %vm3665_vm12, %v3629_v0, %v3701_v9  ;;  %v4968_v6 = vadd.f32 %v3458_v7, %v1497_v16  ;;  %v4932_v43 = vpop.f32.mrb[6].mxu0 }
 0x206   : > { %v4344_v4 = vpack.c.bf16 %v3737_v42, %v3736_v55  ;;  %v3634_v44 = vadd.f32 %v4967_v15, %v6332_v40  ;;  %v4969_v25 = vadd.f32 %v4932_v43, %v4742_v11  ;;  %v3461_v36 = vpop.f32.mrb[7].mxu0 }
 0x207   : > { %4431 = vst [vmem:[%s6342_s6 + $0x8] sm:$0xff] %v4349_v12   ;;  %v3632_v59 = vadd.f32 %v4968_v6, %v6332_v40  ;;  %v4970_v34 = vadd.f32 %v3461_v36, %v1500_v19 }
 0x208   : > { %4345 = vst [vmem:[%s6342_s6] sm:$0xff] %v4344_v4   ;;  %v3706_v49 = vmul.f32 0.1, %v3634_v44  ;;  %v3635_v47 = vadd.f32 %v4969_v25, %v6332_v40  ;;  %vm3670_vm13 = vcmp.gt.f32.partialorder %v3634_v44, 0.0 }
 0x209   : > { %v3704_v50 = vmul.f32 0.1, %v3632_v59  ;;  %v3633_v24 = vadd.f32 %v4970_v34, %v6332_v40  ;;  %vm3668_vm14 = vcmp.gt.f32.partialorder %v3632_v59, 0.0 }
 0x20a   : > { %vm3671_vm15 = vcmp.gt.f32.partialorder %v3635_v47, 0.0  ;;  %v3707_v63 = vmul.f32 0.1, %v3635_v47  ;;  %v3742_v53 = vsel %vm3670_vm13, %v3634_v44, %v3706_v49 }
 0x20b   : > { %vm3669_vm0 = vcmp.gt.f32.partialorder %v3633_v24, 0.0  ;;  %v3705_v45 = vmul.f32 0.1, %v3633_v24  ;;  %v4935_v35 = vpop.f32.mrb[8].mxu0  ;;  %v3740_v41 = vsel %vm3668_vm14, %v3632_v59, %v3704_v50 }
 0x20c   : > { %v3743_v38 = vsel %vm3671_vm15, %v3635_v47, %v3707_v63  ;;  %v4971_v14 = vadd.f32 %v4935_v35, %v6305_v32  ;;  %v3474_v29 = vpop.f32.mrb[9].mxu0 }
 0x20d   : > { %v4359_v51 = vpack.c.bf16 %v3743_v38, %v3742_v53  ;;  %v3741_v58 = vsel %vm3669_vm0, %v3633_v24, %v3705_v45  ;;  %v4972_v5 = vadd.f32 %v3474_v29, %v6307_v10  ;;  %v4936_v27 = vpop.f32.mrb[10].mxu0 }
 0x20e   : > { %v4354_v16 = vpack.c.bf16 %v3741_v58, %v3740_v41  ;;  %v3638_v11 = vadd.f32 %v4971_v14, %v6332_v40  ;;  %v4973_v19 = vadd.f32 %v4936_v27, %v6309_v54  ;;  %v3477_v23 = vpop.f32.mrb[11].mxu0 }
 0x20f   : > { %4433 = vst [vmem:[%s6342_s6 + $0x18] sm:$0xff] %v4359_v51   ;;  %v3636_v28 = vadd.f32 %v4972_v5, %v6332_v40  ;;  %v4974_v17 = vadd.f32 %v3477_v23, %v6311_v56 }
 0x210   : > { %4432 = vst [vmem:[%s6342_s6 + $0x10] sm:$0xff] %v4354_v16   ;;  %v3710_v32 = vmul.f32 0.1, %v3638_v11  ;;  %v3639_v18 = vadd.f32 %v4973_v19, %v6332_v40  ;;  %vm3674_vm1 = vcmp.gt.f32.partialorder %v3638_v11, 0.0 }
 0x211   : > { %v3708_v20 = vmul.f32 0.1, %v3636_v28  ;;  %v3637_v10 = vadd.f32 %v4974_v17, %v6332_v40  ;;  %vm3672_vm2 = vcmp.gt.f32.partialorder %v3636_v28, 0.0 }
 0x212   : > { %vm3675_vm3 = vcmp.gt.f32.partialorder %v3639_v18, 0.0  ;;  %v3711_v31 = vmul.f32 0.1, %v3639_v18  ;;  %v3746_v60 = vsel %vm3674_vm1, %v3638_v11, %v3710_v32 }
 0x213   : > { %vm3673_vm4 = vcmp.gt.f32.partialorder %v3637_v10, 0.0  ;;  %v3709_v26 = vmul.f32 0.1, %v3637_v10  ;;  %v4939_v54 = vpop.f32.mrb[12].mxu0  ;;  %v3744_v62 = vsel %vm3672_vm2, %v3636_v28, %v3708_v20 }
 0x214   : > { %v3747_v61 = vsel %vm3675_vm3, %v3639_v18, %v3711_v31  ;;  %v4975_v30 = vadd.f32 %v4939_v54, %v6313_v21  ;;  %v3490_v56 = vpop.f32.mrb[13].mxu0 }
 0x215   : > { %v4369_v1 = vpack.c.bf16 %v3747_v61, %v3746_v60  ;;  %v3745_v52 = vsel %vm3673_vm4, %v3637_v10, %v3709_v26  ;;  %v4976_v0 = vadd.f32 %v3490_v56, %v6315_v46  ;;  %v4940_v48 = vpop.f32.mrb[14].mxu0 }
 0x216   : > { %v4364_v9 = vpack.c.bf16 %v3745_v52, %v3744_v62  ;;  %v3642_v33 = vadd.f32 %v4975_v30, %v6332_v40  ;;  %v4977_v39 = vadd.f32 %v4940_v48, %v6317_v2  ;;  %v3493_v57 = vpop.f32.mrb[15].mxu0 }
 0x217   : > { %4435 = vst [vmem:[%s6342_s6 + $0x28] sm:$0xff] %v4369_v1   ;;  %v3640_v7 = vadd.f32 %v4976_v0, %v6332_v40  ;;  %v4978_v21 = vadd.f32 %v3493_v57, %v6319_v8 }
 0x218   : > { %v4795_v15 = vpop.f32.mrb[20].mxu1  ;;  %4434 = vst [vmem:[%s6342_s6 + $0x20] sm:$0xff] %v4364_v9   ;;  %v3714_v12 = vmul.f32 0.1, %v3642_v33  ;;  %v3643_v42 = vadd.f32 %v4977_v39, %v6332_v40  ;;  %vm3678_vm5 = vcmp.gt.f32.partialorder %v3642_v33, 0.0 }
 0x219   : > { %v2008_v55 = vpop.f32.mrb[21].mxu1  ;;  %v3712_v46 = vmul.f32 0.1, %v3640_v7  ;;  %v3641_v43 = vadd.f32 %v4978_v21, %v6332_v40  ;;  %vm3676_vm6 = vcmp.gt.f32.partialorder %v3640_v7, 0.0 }
 0x21a   : > { %v4796_v6 = vpop.f32.mrb[22].mxu1  ;;  %vm3679_vm7 = vcmp.gt.f32.partialorder %v3643_v42, 0.0  ;;  %v3715_v2 = vmul.f32 0.1, %v3643_v42  ;;  %v3750_v36 = vsel %vm3678_vm5, %v3642_v33, %v3714_v12 }
 0x21b   : > { %v2011_v4 = vpop.f32.mrb[23].mxu1  ;;  %vm3677_vm8 = vcmp.gt.f32.partialorder %v3641_v43, 0.0  ;;  %v3713_v44 = vmul.f32 0.1, %v3641_v43  ;;  %v4943_v25 = vpop.f32.mrb[16].mxu0  ;;  %v3748_v49 = vsel %vm3676_vm6, %v3640_v7, %v3712_v46 }
 0x21c   : > { %v3751_v8 = vsel %vm3679_vm7, %v3643_v42, %v3715_v2  ;;  %v4979_v59 = vadd.f32 %v4943_v25, %v6321_v22  ;;  %v3506_v34 = vpop.f32.mrb[17].mxu0 }
 0x21d   : > { %v4379_v47 = vpack.c.bf16 %v3751_v8, %v3750_v36  ;;  %v3749_v50 = vsel %vm3677_vm8, %v3641_v43, %v3713_v44  ;;  %v4980_v24 = vadd.f32 %v3506_v34, %v6323_v37  ;;  %v4944_v63 = vpop.f32.mrb[18].mxu0 }
 0x21e   : > { %v4374_v45 = vpack.c.bf16 %v3749_v50, %v3748_v49  ;;  %v3646_v35 = vadd.f32 %v4979_v59, %v6332_v40  ;;  %v4981_v53 = vadd.f32 %v4944_v63, %v6325_v13  ;;  %v3509_v38 = vpop.f32.mrb[19].mxu0 }
 0x21f   : > { %4437 = vst [vmem:[%s6342_s6 + $0x38] sm:$0xff] %v4379_v47   ;;  %v3644_v29 = vadd.f32 %v4980_v24, %v6332_v40  ;;  %v4982_v22 = vadd.f32 %v3509_v38, %v6327_v3 }
 0x220   : > { %v4799_v14 = vpop.f32.mrb[24].mxu1  ;;  %4436 = vst [vmem:[%s6342_s6 + $0x30] sm:$0xff] %v4374_v45   ;;  %v3718_v51 = vmul.f32 0.1, %v3646_v35  ;;  %v3647_v58 = vadd.f32 %v4981_v53, %v6332_v40  ;;  %vm3682_vm9 = vcmp.gt.f32.partialorder %v3646_v35, 0.0 }
 0x221   : > { %v2024_v41 = vpop.f32.mrb[25].mxu1  ;;  %v3716_v37 = vmul.f32 0.1, %v3644_v29  ;;  %v3645_v27 = vadd.f32 %v4982_v22, %v6332_v40  ;;  %vm3680_vm10 = vcmp.gt.f32.partialorder %v3644_v29, 0.0 }
 0x222   : > { %v4800_v5 = vpop.f32.mrb[26].mxu1  ;;  %vm3683_vm11 = vcmp.gt.f32.partialorder %v3647_v58, 0.0  ;;  %v3719_v13 = vmul.f32 0.1, %v3647_v58  ;;  %v3754_v23 = vsel %vm3682_vm9, %v3646_v35, %v3718_v51 }
 0x223   : > { %v2027_v16 = vpop.f32.mrb[27].mxu1  ;;  %vm3681_vm12 = vcmp.gt.f32.partialorder %v3645_v27, 0.0  ;;  %v3717_v11 = vmul.f32 0.1, %v3645_v27  ;;  %v4947_v19 = vpop.f32.mrb[20].mxu0  ;;  %v3752_v32 = vsel %vm3680_vm10, %v3644_v29, %v3716_v37 }
 0x224   : > { %v3755_v3 = vsel %vm3683_vm11, %v3647_v58, %v3719_v13  ;;  %v4983_v28 = vadd.f32 %v4947_v19, %v4795_v15  ;;  %v3522_v17 = vpop.f32.mrb[21].mxu0 }
 0x225   : > { %v4389_v18 = vpack.c.bf16 %v3755_v3, %v3754_v23  ;;  %v3753_v20 = vsel %vm3681_vm12, %v3645_v27, %v3717_v11  ;;  %v4984_v10 = vadd.f32 %v3522_v17, %v2008_v55  ;;  %v4948_v31 = vpop.f32.mrb[22].mxu0 }
 0x226   : > { %v4384_v26 = vpack.c.bf16 %v3753_v20, %v3752_v32  ;;  %v3650_v54 = vadd.f32 %v4983_v28, %v6332_v40  ;;  %v4985_v60 = vadd.f32 %v4948_v31, %v4796_v6  ;;  %v3525_v61 = vpop.f32.mrb[23].mxu0 }
 0x227   : > { %4439 = vst [vmem:[%s6342_s6 + $0x48] sm:$0xff] %v4389_v18   ;;  %v3648_v56 = vadd.f32 %v4984_v10, %v6332_v40  ;;  %v4986_v62 = vadd.f32 %v3525_v61, %v2011_v4 }
 0x228   : > { %v4803_v30 = vpop.f32.mrb[28].mxu1  ;;  %4438 = vst [vmem:[%s6342_s6 + $0x40] sm:$0xff] %v4384_v26   ;;  %v3722_v52 = vmul.f32 0.1, %v3650_v54  ;;  %v3651_v0 = vadd.f32 %v4985_v60, %v6332_v40  ;;  %vm3686_vm13 = vcmp.gt.f32.partialorder %v3650_v54, 0.0 }
 0x229   : > { %v2040_v1 = vpop.f32.mrb[29].mxu1  ;;  %v3720_v9 = vmul.f32 0.1, %v3648_v56  ;;  %v3649_v33 = vadd.f32 %v4986_v62, %v6332_v40  ;;  %vm3684_vm14 = vcmp.gt.f32.partialorder %v3648_v56, 0.0 }
 0x22a   : > { %v4804_v48 = vpop.f32.mrb[30].mxu1  ;;  %vm3687_vm15 = vcmp.gt.f32.partialorder %v3651_v0, 0.0  ;;  %v3723_v57 = vmul.f32 0.1, %v3651_v0  ;;  %v3758_v21 = vsel %vm3686_vm13, %v3650_v54, %v3722_v52 }
 0x22b   : > { %v2043_v39 = vpop.f32.mrb[31].mxu1  ;;  %vm3685_vm0 = vcmp.gt.f32.partialorder %v3649_v33, 0.0  ;;  %v3721_v15 = vmul.f32 0.1, %v3649_v33  ;;  %v4951_v7 = vpop.f32.mrb[24].mxu0  ;;  %v3756_v6 = vsel %vm3684_vm14, %v3648_v56, %v3720_v9 }
 0x22c   : > { %v3759_v55 = vsel %vm3687_vm15, %v3651_v0, %v3723_v57  ;;  %v4987_v12 = vadd.f32 %v4951_v7, %v4799_v14  ;;  %v3538_v42 = vpop.f32.mrb[25].mxu0 }
 0x22d   : > { %v4399_v46 = vpack.c.bf16 %v3759_v55, %v3758_v21  ;;  %v3757_v43 = vsel %vm3685_vm0, %v3649_v33, %v3721_v15  ;;  %v4988_v4 = vadd.f32 %v3538_v42, %v2024_v41  ;;  %v4952_v2 = vpop.f32.mrb[26].mxu0 }
 0x22e   : > { %v4394_v44 = vpack.c.bf16 %v3757_v43, %v3756_v6  ;;  %v3654_v25 = vadd.f32 %v4987_v12, %v6332_v40  ;;  %v4989_v36 = vadd.f32 %v4952_v2, %v4800_v5  ;;  %v3541_v8 = vpop.f32.mrb[27].mxu0 }
 0x22f   : > { %4441 = vst [vmem:[%s6342_s6 + $0x58] sm:$0xff] %v4399_v46   ;;  %v3652_v34 = vadd.f32 %v4988_v4, %v6332_v40  ;;  %v4990_v49 = vadd.f32 %v3541_v8, %v2027_v16 }
 0x230   : > { %v4807_v59 = vpop.f32.mrb[32].mxu1  ;;  %4440 = vst [vmem:[%s6342_s6 + $0x50] sm:$0xff] %v4394_v44   ;;  %v3726_v50 = vmul.f32 0.1, %v3654_v25  ;;  %v3655_v24 = vadd.f32 %v4989_v36, %v6332_v40  ;;  %vm3690_vm1 = vcmp.gt.f32.partialorder %v3654_v25, 0.0 }
 0x231   : > { %v2056_v47 = vpop.f32.mrb[33].mxu1  ;;  %v3724_v45 = vmul.f32 0.1, %v3652_v34  ;;  %v3653_v35 = vadd.f32 %v4990_v49, %v6332_v40  ;;  %vm3688_vm2 = vcmp.gt.f32.partialorder %v3652_v34, 0.0 }
 0x232   : > { %v4808_v63 = vpop.f32.mrb[34].mxu1  ;;  %vm3691_vm3 = vcmp.gt.f32.partialorder %v3655_v24, 0.0  ;;  %v3727_v38 = vmul.f32 0.1, %v3655_v24  ;;  %v3762_v22 = vsel %vm3690_vm1, %v3654_v25, %v3726_v50 }
 0x233   : > { %v2059_v53 = vpop.f32.mrb[35].mxu1  ;;  %vm3689_vm4 = vcmp.gt.f32.partialorder %v3653_v35, 0.0  ;;  %v3725_v14 = vmul.f32 0.1, %v3653_v35  ;;  %v4955_v29 = vpop.f32.mrb[28].mxu0  ;;  %v3760_v5 = vsel %vm3688_vm2, %v3652_v34, %v3724_v45 }
 0x234   : > { %v3763_v41 = vsel %vm3691_vm3, %v3655_v24, %v3727_v38  ;;  %v4991_v51 = vadd.f32 %v4955_v29, %v4803_v30  ;;  %v3554_v58 = vpop.f32.mrb[29].mxu0 }
 0x235   : > { %v4409_v37 = vpack.c.bf16 %v3763_v41, %v3762_v22  ;;  %v3761_v27 = vsel %vm3689_vm4, %v3653_v35, %v3725_v14  ;;  %v4992_v16 = vadd.f32 %v3554_v58, %v2040_v1  ;;  %v4956_v13 = vpop.f32.mrb[30].mxu0 }
 0x236   : > { %v4404_v11 = vpack.c.bf16 %v3761_v27, %v3760_v5  ;;  %v3658_v19 = vadd.f32 %v4991_v51, %v6332_v40  ;;  %v4993_v23 = vadd.f32 %v4956_v13, %v4804_v48  ;;  %v3557_v3 = vpop.f32.mrb[31].mxu0 }
 0x237   : > { %4443 = vst [vmem:[%s6342_s6 + $0x68] sm:$0xff] %v4409_v37   ;;  %v3656_v28 = vadd.f32 %v4992_v16, %v6332_v40  ;;  %v4994_v17 = vadd.f32 %v3557_v3, %v2043_v39 }
 0x238   : > { %4442 = vst [vmem:[%s6342_s6 + $0x60] sm:$0xff] %v4404_v11   ;;  %v3730_v32 = vmul.f32 0.1, %v3658_v19  ;;  %v3659_v18 = vadd.f32 %v4993_v23, %v6332_v40  ;;  %vm3694_vm5 = vcmp.gt.f32.partialorder %v3658_v19, 0.0 }
 0x239   : > { %v3728_v20 = vmul.f32 0.1, %v3656_v28  ;;  %v3657_v10 = vadd.f32 %v4994_v17, %v6332_v40  ;;  %vm3692_vm6 = vcmp.gt.f32.partialorder %v3656_v28, 0.0 }
 0x23a   : > { %vm3695_vm7 = vcmp.gt.f32.partialorder %v3659_v18, 0.0  ;;  %v3731_v31 = vmul.f32 0.1, %v3659_v18  ;;  %v3766_v60 = vsel %vm3694_vm5, %v3658_v19, %v3730_v32 }
 0x23b   : > { %vm3693_vm8 = vcmp.gt.f32.partialorder %v3657_v10, 0.0  ;;  %v3729_v26 = vmul.f32 0.1, %v3657_v10  ;;  %v4959_v54 = vpop.f32.mrb[32].mxu0  ;;  %v3764_v62 = vsel %vm3692_vm6, %v3656_v28, %v3728_v20 }
 0x23c   : > { %v3767_v61 = vsel %vm3695_vm7, %v3659_v18, %v3731_v31  ;;  %v4995_v30 = vadd.f32 %v4959_v54, %v4807_v59  ;;  %v3570_v56 = vpop.f32.mrb[33].mxu0 }
 0x23d   : > { %v4419_v1 = vpack.c.bf16 %v3767_v61, %v3766_v60  ;;  %v3765_v52 = vsel %vm3693_vm8, %v3657_v10, %v3729_v26  ;;  %v4996_v0 = vadd.f32 %v3570_v56, %v2056_v47  ;;  %v4960_v48 = vpop.f32.mrb[34].mxu0 }
 0x23e   : > { %v4414_v9 = vpack.c.bf16 %v3765_v52, %v3764_v62  ;;  %v3662_v33 = vadd.f32 %v4995_v30, %v6332_v40  ;;  %v4997_v39 = vadd.f32 %v4960_v48, %v4808_v63  ;;  %v3573_v57 = vpop.f32.mrb[35].mxu0 }
 0x23f   : > { %4445 = vst [vmem:[%s6342_s6 + $0x78] sm:$0xff] %v4419_v1   ;;  %v3660_v15 = vadd.f32 %v4996_v0, %v6332_v40  ;;  %v4998_v7 = vadd.f32 %v3573_v57, %v2059_v53 }
 0x240   : > { %4444 = vst [vmem:[%s6342_s6 + $0x70] sm:$0xff] %v4414_v9   ;;  %v3734_v21 = vmul.f32 0.1, %v3662_v33  ;;  %v3663_v55 = vadd.f32 %v4997_v39, %v6332_v40  ;;  %vm3698_vm9 = vcmp.gt.f32.partialorder %v3662_v33, 0.0 }
 0x241   : > { %v3732_v12 = vmul.f32 0.1, %v3660_v15  ;;  %v3661_v42 = vadd.f32 %v4998_v7, %v6332_v40  ;;  %vm3696_vm10 = vcmp.gt.f32.partialorder %v3660_v15, 0.0 }
 0x242   : > { %vm3699_vm11 = vcmp.gt.f32.partialorder %v3663_v55, 0.0  ;;  %v3735_v6 = vmul.f32 0.1, %v3663_v55  ;;  %v3770_v43 = vsel %vm3698_vm9, %v3662_v33, %v3734_v21 }
 0x243   : > { %vm3697_vm12 = vcmp.gt.f32.partialorder %v3661_v42, 0.0  ;;  %v3733_v46 = vmul.f32 0.1, %v3661_v42  ;;  %v3768_v2 = vsel %vm3696_vm10, %v3660_v15, %v3732_v12 }
 0x244   : > { %v3771_v4 = vsel %vm3699_vm11, %v3663_v55, %v3735_v6 }
 0x245   : > { %v4429_v44 = vpack.c.bf16 %v3771_v4, %v3770_v43  ;;  %v3769_v25 = vsel %vm3697_vm12, %v3661_v42, %v3733_v46 }
 0x246   : > { %v4424_v40 = vpack.c.bf16 %v3769_v25, %v3768_v2 }
 0x247   : > { %4447 = vst [vmem:[%s6342_s6 + $0x88] sm:$0xff] %v4429_v44  }
 0x248   : > { %4446 = vst [vmem:[%s6342_s6 + $0x80] sm:$0xff] %v4424_v40  }
 0x249   : > { %5381 = shalt.err (!%p5378_p3)
}
 0x24a   : > { %s5382_s25 = scalar_lea.hbm %s6408_s11, 2304  ;;  %s5386_s28 = scalar_lea.hbm %s6460_s3, 4608 }
 0x24b   : > { %p5383_p4 = scmp.ne.s32.totalorder %s6408_s11, %s5382_s25  ;;  %p5387_p9 = scmp.lt.u32.totalorder %s6408_s11, %s6460_s3 }
 0x24c   : > { %p5388_p10 = scmp.lt.u32.totalorder %s5386_s28, %s5382_s25  ;;  %p5390_p12 = scmp.lt.u32.totalorder %s5382_s25, %s6408_s11 }
 0x24d   : > { %p5384_p7 = pnand %p5383_p4, %p5494_p5 }
 0x24e   : > { %p5389_p11 = por %p5388_p10, %p5387_p9 }
 0x24f   : > { %p5385_p8 = pneg %p5384_p7 }
 0x250   : > { %p5391_p13 = por %p5390_p12, %p5389_p11 }
 0x252   : > { %p5392_p0 = pnand %p5391_p13, %p5385_p8 }
 0x254   : > { %5395 = shalt.err (!%p5392_p0)
}
 0x255   : > { %s5434_s4 = smov 64   ;;  %s5435_s5 = smov 4  }
 0x256   : > { %5254 = dma.vmem_to_hbm [thread:$0]  (%p5494_p5), %s6410_s8, 2304, %s6408_s11, %s6416_s16, %s5434_s4, %s5434_s4, %s5435_s5  }
 0x257 PF: > { %p5260_p1 = scmp.ge.s32.totalorder %s5430_s15, 2  ;;  %s3981_s6 = sand.u32 1, %s5418_s12  }
 0x258   : > { %s3982_s7 = scalar_lea.sflag [#allocation3], %s3981_s6 }
 0x259   : > { %p5257_p2 = pnand %p5260_p1, %p5498_p6 }
 0x25b   : > { %5413 = dma.done.wait (!%p5257_p2), %s3982_s7, 2304  }
 0x25c   : > { %5415 = vsyncadd (!%p5257_p2), %s3982_s7, 4294964992  ;;  %p13_p3 = scmp.ge.s32.totalorder %s5481_s18, 4   ;;  %s6463_s12 = smov %s5422_s13 }
 0x25d   : > { %s6464_s13 = smov %s5426_s14  ;;  %s6465_s14 = smov %s5492_s21 }
 0x25e   : > { %s6466_s15 = smov %s5481_s18  ;;  %15 = sbr.rel (!%p13_p3) target bundleno = 3 (0x3), region = 75 }
 0x265   :  { %3987 = vsyncpa [#allocation3], 1 }
 0x266   :  { %3989 = vsyncpa [#allocation3 + $0x1], 1 }

</bundles_post_ra>
